<compile_context>
chip_gen: v7x
topology: tpu7x:2x2x1
jax: 0.10.0
libtpu: 0.0.40
codegen_flags: <defaults>
</compile_context>

<pallas_src>
import math

import jax
import jax.numpy as jnp
from jax.experimental import pallas as pl
from jax.experimental.pallas import tpu as pltpu


def _pe_kernel(freqs_ref, coords_ref, out_ref):
    """out[c, p]    = sin(xn[p]*F[c,0] + yn[p]*F[c,1])   for c <  C
       out[C+c, p]  = cos(xn[p]*F[c,0] + yn[p]*F[c,1])   for c <  C

    freqs_ref : (C, 2)       col0 = 2*pi*G[0, c], col1 = 2*pi*G[1, c]
    coords_ref: (2, tile_n)  row0 = xn in [-1,1], row1 = yn in [-1,1]
    out_ref   : (2C, tile_n)
    """
    c = freqs_ref.shape[0]
    gx = freqs_ref[:, 0:1]            # (C, 1)
    gy = freqs_ref[:, 1:2]            # (C, 1)
    xn = coords_ref[0:1, :]           # (1, tile_n)
    yn = coords_ref[1:2, :]           # (1, tile_n)
    # Shared Fourier argument: two broadcast FMAs on the VPU, computed once
    # for both the sin and cos halves.
    u = xn * gx + yn * gy             # (C, tile_n)
    out_ref[0:c, :] = jnp.sin(u)      # 64-sublane aligned, lane-dense store
    out_ref[c:2 * c, :] = jnp.cos(u)  # 64-sublane aligned, lane-dense store


def _round_up(x, m):
    return ((x + m - 1) // m) * m


def _num_parallel_cores():
    """TensorCores that share a 'parallel' grid axis on the current device."""
    try:
        kind = jax.devices()[0].device_kind.lower()
    except Exception:
        return 1
    if "v7" in kind or "v4" in kind or "v5p" in kind:
        return 2
    return 1


def _pick_tiling(n, num_cores, max_tile_positions=8192):
    """Choose (tile_n, n_pad): tile_n is a multiple of 128 dividing n_pad.

    max_tile_positions = 8192 -> f32 output block of 128 x 8192 = 4 MiB
    (~8.2 MiB double-buffered with coords), safe under every generation's
    scoped-VMEM default.  Single-TC chips get the fewest/largest steps;
    dual-TC chips get an even >=2-way split for core balance.
    """
    n128 = _round_up(max(n, 1), 128)
    if num_cores <= 1 or n128 <= 128 * num_cores:
        tile = min(n128, max_tile_positions)
    else:
        steps = max(2, pl.cdiv(n128, max_tile_positions))
        if steps % 2:
            steps += 1                      # even step count for 2 TCs
        tile = _round_up(pl.cdiv(n128, steps), 128)
    n_pad = _round_up(n128, tile)
    return tile, n_pad


def position_embedding_random_forward(gaussian_matrix, size, *, tile_n=None):
    """Equivalent of PositionEmbeddingRandom.forward(size).

    gaussian_matrix: (2, num_pos_feats) float32
    size: (h, w) static ints
    returns: (2*num_pos_feats, h, w) float32 (PyTorch channel-first layout)
    """
    h, w = int(size[0]), int(size[1])
    num_pos_feats = int(gaussian_matrix.shape[1])
    c_out = 2 * num_pos_feats
    n = h * w

    if tile_n is None:
        tile_n, n_pad = _pick_tiling(n, _num_parallel_cores())
    else:
        tile_n = int(tile_n)
        n_pad = _round_up(n, tile_n)

    # (C, 2) frequency table with 2*pi folded in.
    freqs = (jnp.float32(2.0 * math.pi)
             * gaussian_matrix.astype(jnp.float32).T)                # (C, 2)

    # Normalized coordinates in [-1, 1], flattened row-major, zero-padded to
    # n_pad (padded tail is sliced off after the kernel).  Matches
    # (cumsum(ones) - 0.5)/dim == (index + 0.5)/dim exactly.
    col = jax.lax.broadcasted_iota(jnp.float32, (h, w), 1)
    row = jax.lax.broadcasted_iota(jnp.float32, (h, w), 0)
    xn = (2.0 * ((col + 0.5) / jnp.float32(w)) - 1.0).reshape(1, n)
    yn = (2.0 * ((row + 0.5) / jnp.float32(h)) - 1.0).reshape(1, n)
    coords = jnp.concatenate([xn, yn], axis=0)                       # (2, n)
    if n_pad > n:
        coords = jnp.pad(coords, ((0, 0), (0, n_pad - n)))           # (2, n_pad)

    cost = pl.CostEstimate(
        flops=3 * n_pad * num_pos_feats,          # 2 mul + 1 add per u element
        transcendentals=n_pad * c_out,            # one sin + one cos per u elem
        bytes_accessed=(n_pad * c_out + 2 * n_pad + 2 * num_pos_feats) * 4,
    )

    pe_flat = pl.pallas_call(
        _pe_kernel,
        out_shape=jax.ShapeDtypeStruct((c_out, n_pad), jnp.float32),
        grid_spec=pltpu.PrefetchScalarGridSpec(
            num_scalar_prefetch=0,
            grid=(n_pad // tile_n,),
            in_specs=[
                pl.BlockSpec((num_pos_feats, 2), lambda i: (0, 0)),   # freqs (const)
                pl.BlockSpec((2, tile_n), lambda i: (0, i)),          # coords tile
            ],
            out_specs=pl.BlockSpec((c_out, tile_n), lambda i: (0, i)),
        ),
        compiler_params=pltpu.CompilerParams(
            dimension_semantics=("parallel",),
            # Let XLA fuse the tiny iota/normalize coords producer into the
            # pallas_call input (avoids a separate HBM write+read for it).
            allow_input_fusion=[False, True],
        ),
        cost_estimate=cost,
    )(freqs, coords)

    # (2C, n_pad) -> drop padding -> (2C, H, W): contiguous row-major reshape.
    return pe_flat[:, :n].reshape(c_out, h, w)


def _reference_forward(gaussian_matrix, size):
    """Pure-JAX reference mirroring the PyTorch module, for correctness check."""
    h, w = size
    grid = jnp.ones((h, w), jnp.float32)
    y_embed = (jnp.cumsum(grid, axis=0) - 0.5) / h
    x_embed = (jnp.cumsum(grid, axis=1) - 0.5) / w
    coords = jnp.stack([x_embed, y_embed], axis=-1)
    coords = 2.0 * coords - 1.0
    coords = coords @ gaussian_matrix
    coords = 2.0 * jnp.pi * coords
    pe = jnp.concatenate([jnp.sin(coords), jnp.cos(coords)], axis=-1)
    return jnp.transpose(pe, (2, 0, 1))


if __name__ == "__main__":
    num_pos_feats = 64
    scale = 1.0

    # Deterministic synthetic "buffer": scale * randn((2, num_pos_feats))
    key = jax.random.PRNGKey(0)
    gaussian_matrix = scale * jax.random.normal(
        key, (2, num_pos_feats), dtype=jnp.float32)

    # (16, 16): lane-aligned N; (7, 9): exercises the padded / sliced path.
    for (h, w) in [(16, 16), (7, 9)]:
        out = position_embedding_random_forward(gaussian_matrix, (h, w))
        out = jax.block_until_ready(out)
        assert out.shape == (2 * num_pos_feats, h, w), out.shape
        assert out.dtype == jnp.float32
        ref = _reference_forward(gaussian_matrix, (h, w))
        max_err = float(jnp.max(jnp.abs(out - ref)))
        assert jnp.allclose(out, ref, atol=1e-5, rtol=1e-5), f"mismatch: {max_err}"

    # TODO(synk): forward_with_coords (arbitrary user-supplied points) is a
    # separate method and is not needed for forward(size); the same kernel
    # works by feeding user coords instead of the grid coords.
    print("KERNEL_OK")
</pallas_src>

<mosaic_0001>
module attributes {stable_mosaic.version = 11 : i64} {
  func.func @_pe_kernel(%arg0: i32, %arg1: memref<64x2xf32, #tpu.memory_space<vmem>>, %arg2: memref<2x256xf32, #tpu.memory_space<vmem>>, %arg3: memref<128x256xf32, #tpu.memory_space<vmem>>) attributes {dimension_semantics = [#tpu.dimension_semantics<parallel>], iteration_bounds = array<i64: 1>, scalar_prefetch = 0 : i64, scratch_operands = 0 : i64, tpu.core_type = #tpu.core_type<tc>, window_params = [{pipeline_mode = #tpu.pipeline_mode<synchronous>, transform_indices = @transform_0, window_bounds = array<i64: 64, 2>}, {transform_indices = @transform_1, window_bounds = array<i64: 2, 256>}, {transform_indices = @transform_2, window_bounds = array<i64: 128, 256>}]} {
    %c0 = arith.constant 0 : index
    %c0_0 = arith.constant 0 : index
    %0 = vector.load %arg1[%c0, %c0_0] : memref<64x2xf32, #tpu.memory_space<vmem>>, vector<64x1xf32>
    %c0_1 = arith.constant 0 : index
    %c1 = arith.constant 1 : index
    %1 = vector.load %arg1[%c0_1, %c1] : memref<64x2xf32, #tpu.memory_space<vmem>>, vector<64x1xf32>
    %c0_2 = arith.constant 0 : index
    %c0_3 = arith.constant 0 : index
    %2 = vector.load %arg2[%c0_2, %c0_3] : memref<2x256xf32, #tpu.memory_space<vmem>>, vector<1x256xf32>
    %c1_4 = arith.constant 1 : index
    %c0_5 = arith.constant 0 : index
    %3 = vector.load %arg2[%c1_4, %c0_5] : memref<2x256xf32, #tpu.memory_space<vmem>>, vector<1x256xf32>
    %4 = vector.broadcast %2 : vector<1x256xf32> to vector<64x256xf32>
    %5 = vector.broadcast %0 : vector<64x1xf32> to vector<64x256xf32>
    %6 = arith.mulf %4, %5 : vector<64x256xf32>
    %7 = vector.broadcast %3 : vector<1x256xf32> to vector<64x256xf32>
    %8 = vector.broadcast %1 : vector<64x1xf32> to vector<64x256xf32>
    %9 = arith.mulf %7, %8 : vector<64x256xf32>
    %10 = arith.addf %6, %9 : vector<64x256xf32>
    %11 = math.sin %10 : vector<64x256xf32>
    %c0_6 = arith.constant 0 : index
    %c0_7 = arith.constant 0 : index
    %12 = vector.load %arg3[%c0_6, %c0_7] : memref<128x256xf32, #tpu.memory_space<vmem>>, vector<64x256xf32>
    tpu.vector_store %arg3[%c0_6, %c0_7], %11 {strides = array<i32>} : memref<128x256xf32, #tpu.memory_space<vmem>>, vector<64x256xf32>,
    %13 = math.cos %10 : vector<64x256xf32>
    %c64 = arith.constant 64 : index
    %c0_8 = arith.constant 0 : index
    %14 = vector.load %arg3[%c64, %c0_8] : memref<128x256xf32, #tpu.memory_space<vmem>>, vector<64x256xf32>
    tpu.vector_store %arg3[%c64, %c0_8], %13 {strides = array<i32>} : memref<128x256xf32, #tpu.memory_space<vmem>>, vector<64x256xf32>,
    return
  }
  func.func @transform_0(%arg0: i32) -> (i32, i32) {
    %c0_i32 = arith.constant 0 : i32
    %c0_i32_0 = arith.constant 0 : i32
    %c0_i32_1 = arith.constant 0 : i32
    return %c0_i32, %c0_i32_0 : i32, i32
  }
  func.func @transform_1(%arg0: i32) -> (i32, i32) {
    %c0_i32 = arith.constant 0 : i32
    %c0_i32_0 = arith.constant 0 : i32
    return %c0_i32, %arg0 : i32, i32
  }
  func.func @transform_2(%arg0: i32) -> (i32, i32) {
    %c0_i32 = arith.constant 0 : i32
    %c0_i32_0 = arith.constant 0 : i32
    return %c0_i32, %arg0 : i32, i32
  }
}

</mosaic_0001>

<bundles_post_ra>
// kernel: tpu_custom_call.1
= control target key start
LH: loop header
LB: loop body
LE: loop exit
PB: predicated region body
PF: predicated region fallthrough
CT: control target
= control target key end

     0   :  { %v3821_v2 = vmov 0   ;;  %s5544_s0 = inlined_call_operand.vmem [shape: f32[64,2], index: 0, kind: input, shape index: {}]   ;;  %s5545_s1 = inlined_call_operand.vmem [shape: f32[2,256], index: 1, kind: input, shape index: {}]   ;;  %s5546_s2 = inlined_call_operand.hbm [shape: f32[128,256], index: 2, kind: output, shape index: {}]  }
   0x1   :  { %v14_v0 = vld [vmem:[%s5544_s0 + $0x10] sm:$0xff]  ;;  %v12_v1 = vld [vmem:[%s5544_s0] sm:$0xff]  ;;  %3730 = vset.pattern.permute.xlu1 %v3821_v2  ;;  %3729 = vset.pattern.permute.xlu0 %v3821_v2  ;;  %v15_v3 = vld [vmem:[%s5544_s0 + $0x18] sm:$0xff] }
   0x2   :  { %46 = vperm.xlu1 %3730, %v14_v0   ;;  %36 = vperm.xlu0 %3729, %v12_v1   ;;  %v13_v4 = vld [vmem:[%s5544_s0 + $0x8] sm:$0xff] }
   0x3   :  { %7 = vsyncpa [#allocation3], 0  ;;  %v17_v5 = vld [vmem:[%s5544_s0 + $0x28] sm:$0xff]  ;;  %v16_v6 = vld [vmem:[%s5544_s0 + $0x20] sm:$0xff]  ;;  %v3822_v9 = vmov 1   ;;  %v24_v10 = vlaneseq }
   0x4   :  { %v19_v7 = vld [vmem:[%s5544_s0 + $0x38] sm:$0xff]  ;;  %v18_v8 = vld [vmem:[%s5544_s0 + $0x30] sm:$0xff]  ;;  %v20_v14 = vld [vmem:[%s5545_s1] ss:$2 sm:$0x3] }
   0x5   :  { %v25_v11 = vshrl.u32 %v24_v10, 7  ;;  %v3525_v31 = vld [vmem:[%s5545_s1 + $0x1] ss:$2 sm:$0x3]  ;;  %s3829_s1 = smov [#allocation2]  }
   0x6   :  { %51 = vperm.xlu1 %3730, %v15_v3   ;;  %41 = vperm.xlu0 %3729, %v13_v4   ;;  %s3514_s28 = sshll.u32 %s3829_s1, 4  ;;  %s3515_s28 = int_to_ptr.vmem [resolvable:$true] %s3514_s28 }
   0x7   :  { %v26_v12 = vsub.s32 0, %v25_v11  ;;  %v30_v13 = vsub.s32 1, %v25_v11  ;;  %s3797_s29 = scalar_lea.vmem %s3515_s28, 4096  ;;  %p3802_p1 = scmp.lt.s32.totalorder %s3515_s28, %s3515_s28 }
   0x8   :  { %p3798_p0 = scmp.ne.s32.totalorder %s3515_s28, %s3797_s29  ;;  %p3803_p2 = scmp.lt.s32.totalorder %s3797_s29, %s3797_s29 }
   0x9   :  { %v27_v15 = vrot.slane %v20_v14, %v26_v12  ;;  %v31_v16 = vrot.slane %v20_v14, %v30_v13  ;;  %v3901_v38 = vrot.slane %v3525_v31, %v26_v12  ;;  %v3903_v39 = vrot.slane %v3525_v31, %v30_v13 }
   0xa   :  { %61 = vperm.xlu1 %3730, %v17_v5   ;;  %56 = vperm.xlu0 %3729, %v16_v6   ;;  %p3804_p3 = por %p3803_p2, %p3802_p1 }
   0xc   :  { %p3805_p4 = pnand %p3804_p3, %p3798_p0 }
   0xe   :  { %71 = vperm.xlu1 %3730, %v19_v7   ;;  %66 = vperm.xlu0 %3729, %v18_v8  }
  0x12   :  { %3732 = vset.pattern.permute.xlu1 %v3822_v9  ;;  %3731 = vset.pattern.permute.xlu0 %v3822_v9 }
  0x13   :  { %106 = vperm.xlu1 %3732, %v13_v4   ;;  %102 = vperm.xlu0 %3731, %v12_v1  }
  0x17   :  { %110 = vperm.xlu1 %3732, %v14_v0   ;;  %114 = vperm.xlu0 %3731, %v15_v3  }
  0x1b   :  { %118 = vperm.xlu1 %3732, %v16_v6   ;;  %122 = vperm.xlu0 %3731, %v17_v5  }
  0x1f   :  { %126 = vperm.xlu1 %3732, %v18_v8   ;;  %130 = vperm.xlu0 %3731, %v19_v7  }
  0x81   :  { %v47_v17 = vpop.permute.xlu1 %46  ;;  %v37_v18 = vpop.permute.xlu0 %36 }
  0x82   :  { %v3874_v19 = vmul.f32 %v47_v17, %v27_v15  ;;  %v3876_v20 = vmul.f32 %v47_v17, %v31_v16  ;;  %v74_v47 = vmul.f32 %v37_v18, %v27_v15  ;;  %v75_v5 = vmul.f32 %v37_v18, %v31_v16 }
  0x83   :  { %v3823_v17 = vmov 683565275  }
  0x85   :  { %v52_v21 = vpop.permute.xlu1 %51  ;;  %v42_v22 = vpop.permute.xlu0 %41 }
  0x86   :  { %v3878_v23 = vmul.f32 %v52_v21, %v27_v15  ;;  %v3880_v24 = vmul.f32 %v52_v21, %v31_v16  ;;  %v76_v40 = vmul.f32 %v42_v22, %v27_v15  ;;  %v77_v43 = vmul.f32 %v42_v22, %v31_v16 }
  0x87   :  { %v3824_v22 = vmov 2475754826  }
  0x89   :  { %v62_v25 = vpop.permute.xlu1 %61  ;;  %v57_v26 = vpop.permute.xlu0 %56 }
  0x8a   :  { %v3882_v27 = vmul.f32 %v62_v25, %v27_v15  ;;  %v3884_v28 = vmul.f32 %v62_v25, %v31_v16  ;;  %v3886_v29 = vmul.f32 %v57_v26, %v27_v15  ;;  %v3888_v30 = vmul.f32 %v57_v26, %v31_v16 }
  0x8b   :  { %v3825_v26 = vmov 2131351028  }
  0x8d   :  { %v72_v32 = vpop.permute.xlu1 %71  ;;  %v67_v33 = vpop.permute.xlu0 %66 }
  0x8e   :  { %v3893_v34 = vmul.f32 %v72_v32, %v27_v15  ;;  %v3895_v35 = vmul.f32 %v72_v32, %v31_v16  ;;  %v3897_v36 = vmul.f32 %v67_v33, %v27_v15  ;;  %v3899_v37 = vmul.f32 %v67_v33, %v31_v16 }
  0x8f   :  { %v3826_v32 = vmov 2102212464  }
  0x92   :  { %v107_v41 = vpop.permute.xlu1 %106  ;;  %v103_v42 = vpop.permute.xlu0 %102 }
  0x93   :  { %v135_v44 = vmul.f32 %v107_v41, %v3901_v38  ;;  %v136_v45 = vmul.f32 %v107_v41, %v3903_v39  ;;  %v133_v46 = vmul.f32 %v103_v42, %v3901_v38  ;;  %v134_v0 = vmul.f32 %v103_v42, %v3903_v39 }
  0x95   :  { %v3908_v48 = vadd.f32 %v135_v44, %v76_v40  ;;  %v3910_v49 = vadd.f32 %v136_v45, %v77_v43  ;;  %v3912_v50 = vadd.f32 %v133_v46, %v74_v47  ;;  %v3924_v10 = vadd.f32 %v134_v0, %v75_v5 }
  0x96   :  { %v3827_v40 = vmov 920167782   ;;  %v3828_v47 = vmov 1326507024  }
  0x97   :  { %v373_v51 = vand.u32 2147483647, %v3908_v48  ;;  %v376_v52 = vand.u32 2139095040, %v3908_v48  ;;  %v477_v53 = vand.u32 2147483647, %v3910_v49  ;;  %v480_v54 = vand.u32 2139095040, %v3910_v49 }
  0x98   :  { %v168_v59 = vand.u32 2139095040, %v3912_v50  ;;  %v165_v13 = vand.u32 2147483647, %v3912_v50  ;;  %vm375_vm13 = vcmp.lt.s32.totalorder %v3908_v48, 0 }
  0x99   :  { %v377_v55 = vshrl.u32 %v376_v52, 23  ;;  %v380_v56 = vand.u32 8388607, %v373_v51  ;;  %v481_v57 = vshrl.u32 %v480_v54, 23  ;;  %v484_v58 = vand.u32 8388607, %v477_v53 }
  0x9a   :  { %v169_v62 = vshrl.u32 %v168_v59, 23  ;;  %vm4027_vm14 = vcmp.le.f32.partialorder %v373_v51, 0.7853982 }
  0x9b   :  { %v3534_v60 = vadd.s32 4294967169, %v377_v55  ;;  %v3538_v61 = vadd.s32 4294967169, %v481_v57  ;;  %v381_v1 = vor.u32 8388608, %v380_v56  ;;  %v485_v2 = vor.u32 8388608, %v484_v58 }
  0x9c   :  { %v3526_v4 = vadd.s32 4294967169, %v169_v62 }
  0x9d   :  { %v383_v63 = vadd.s32 1, %v3534_v60  ;;  %v487_v3 = vadd.s32 1, %v3538_v61  ;;  %v3926_v11 = vshll.u32 %v381_v1, 8  ;;  %v3928_v12 = vshll.u32 %v485_v2, 8 }
  0x9e   :  { %v3931_v14 = vadd.s32 1, %v3526_v4 }
  0x9f   :  { %vm384_vm0 = vcmp.gt.s32.totalorder %v383_v63, 0  ;;  %vm488_vm1 = vcmp.gt.s32.totalorder %v487_v3, 0 }
  0xa0   :  { %v385_v6 = vsel %vm384_vm0, %v383_v63, 0  ;;  %v489_v9 = vsel %vm488_vm1, %v487_v3, 0  ;;  %vm176_vm6 = vcmp.gt.s32.totalorder %v3931_v14, 0 }
  0xa1   :  { %v386_v7 = vshrl.u32 %v385_v6, 5  ;;  %v387_v8 = vand.u32 31, %v385_v6  ;;  %v3934_v18 = vshrl.u32 %v489_v9, 5  ;;  %v491_v21 = vand.u32 31, %v489_v9 }
  0xa3   :  { %v388_v15 = vsub.s32 32, %v387_v8  ;;  %v390_v16 = vshll.u32 %v3823_v17, %v387_v8  ;;  %v393_v25 = vshll.u32 %v3824_v22, %v387_v8  ;;  %v396_v31 = vshll.u32 %v3825_v26, %v387_v8 }
  0xa4   :  { %v399_v33 = vshll.u32 %v3826_v32, %v387_v8  ;;  %v402_v41 = vshll.u32 %v3827_v40, %v387_v8  ;;  %vm405_vm2 = vcmp.lt.s32.totalorder %v386_v7, 1  ;;  %vm406_vm3 = vcmp.lt.s32.totalorder %v386_v7, 2 }
  0xa5   :  { %v391_v42 = vshrl.u32 %v3824_v22, %v388_v15  ;;  %v394_v43 = vshrl.u32 %v3825_v26, %v388_v15  ;;  %v397_v44 = vshrl.u32 %v3826_v32, %v388_v15  ;;  %v389_v45 = vshrl.u32 %v3823_v17, %v388_v15 }
  0xa6   :  { %v400_v46 = vshrl.u32 %v3827_v40, %v388_v15  ;;  %v403_v52 = vshrl.u32 %v3828_v47, %v388_v15  ;;  %v492_v57 = vsub.s32 32, %v491_v21  ;;  %vm407_vm4 = vcmp.lt.s32.totalorder %v386_v7, 3 }
  0xa7   :  { %v392_v54 = vor.u32 %v391_v42, %v390_v16  ;;  %v395_v55 = vor.u32 %v394_v43, %v393_v25  ;;  %v398_v56 = vor.u32 %v397_v44, %v396_v31  ;;  %vm408_vm5 = vcmp.lt.s32.totalorder %v386_v7, 4 }
  0xa8   :  { %v401_v58 = vor.u32 %v400_v46, %v399_v33  ;;  %v404_v59 = vor.u32 %v403_v52, %v402_v41  ;;  %v494_v3 = vshll.u32 %v3823_v17, %v491_v21  ;;  %v495_v6 = vshrl.u32 %v3824_v22, %v492_v57 }
  0xa9   :  { %v409_v60 = vsel %vm405_vm2, %v389_v45, %v392_v54  ;;  %v410_v61 = vsel %vm408_vm5, %v398_v56, 2102212464  ;;  %v413_v62 = vsel %vm405_vm2, %v392_v54, %v395_v55  ;;  %v417_v63 = vsel %vm405_vm2, %v395_v55, %v398_v56 }
  0xaa   :  { %v411_v0 = vsel %vm407_vm4, %v395_v55, %v410_v61  ;;  %v414_v1 = vsel %vm408_vm5, %v401_v58, 920167782  ;;  %v418_v2 = vsel %vm408_vm5, %v404_v59, 1326507024  ;;  %v497_v8 = vshll.u32 %v3824_v22, %v491_v21 }
  0xab   :  { %v415_v4 = vsel %vm407_vm4, %v398_v56, %v414_v1  ;;  %v419_v5 = vsel %vm407_vm4, %v401_v58, %v418_v2  ;;  %v412_v9 = vsel %vm406_vm3, %v409_v60, %v411_v0  ;;  %v498_v25 = vshrl.u32 %v3825_v26, %v492_v57 }
  0xac   :  { %v416_v15 = vsel %vm406_vm3, %v413_v62, %v415_v4  ;;  %v420_v16 = vsel %vm406_vm3, %v417_v63, %v419_v5  ;;  %v496_v43 = vor.u32 %v495_v6, %v494_v3  ;;  %v500_v45 = vshll.u32 %v3825_v26, %v491_v21 }
  0xad   :  { %v3958_v31 = vmul.u32.u64.low %v3926_v11, %v420_v16  ;;  %v3959_v33 = vmul.u32.u64.high %v3926_v11, %v420_v16, %v3958_v31  ;;  %v3962_v41 = vmul.u32.u64.low %v3926_v11, %v416_v15  ;;  %v3963_v42 = vmul.u32.u64.high %v3926_v11, %v416_v15, %v3962_v41 }
  0xae   :  { %v499_v44 = vor.u32 %v498_v25, %v497_v8  ;;  %v501_v46 = vshrl.u32 %v3826_v32, %v492_v57  ;;  %v493_v7 = vshrl.u32 %v3823_v17, %v492_v57  ;;  %v503_v52 = vshll.u32 %v3826_v32, %v491_v21 }
  0xaf   :  { %v504_v54 = vshrl.u32 %v3827_v40, %v492_v57  ;;  %v507_v55 = vshrl.u32 %v3828_v47, %v492_v57  ;;  %v428_v56 = vmul.u32 %v3926_v11, %v412_v9  ;;  %v506_v59 = vshll.u32 %v3827_v40, %v491_v21 }
  0xb0   :  { %v502_v58 = vor.u32 %v501_v46, %v500_v45  ;;  %vm509_vm7 = vcmp.lt.s32.totalorder %v3934_v18, 1  ;;  %vm430_vm8 = vc.u32 %v3959_v33, %v3962_v41  ;;  %v431_v60 = vadd.s32 1, %v3963_v42 }
  0xb1   :  { %v505_v61 = vor.u32 %v504_v54, %v503_v52  ;;  %vm510_vm9 = vcmp.lt.s32.totalorder %v3934_v18, 2  ;;  %v508_v62 = vor.u32 %v507_v55, %v506_v59  ;;  %vm511_vm10 = vcmp.lt.s32.totalorder %v3934_v18, 3 }
  0xb2   :  { %vm512_vm11 = vcmp.lt.s32.totalorder %v3934_v18, 4  ;;  %v517_v57 = vsel %vm509_vm7, %v496_v43, %v499_v44  ;;  %v432_v11 = vsel %vm430_vm8, %v431_v60, %v3963_v42  ;;  %v521_v0 = vsel %vm509_vm7, %v499_v44, %v502_v58 }
  0xb3   :  { %v514_v63 = vsel %vm512_vm11, %v502_v58, 2102212464  ;;  %v518_v21 = vsel %vm512_vm11, %v505_v61, 920167782  ;;  %v433_v1 = vadd.s32 %v432_v11, %v428_v56  ;;  %v513_v2 = vsel %vm509_vm7, %v493_v7, %v496_v43 }
  0xb4   :  { %v519_v3 = vsel %vm511_vm10, %v502_v58, %v518_v21  ;;  %v522_v4 = vsel %vm512_vm11, %v508_v62, 1326507024  ;;  %v515_v5 = vsel %vm511_vm10, %v499_v44, %v514_v63  ;;  %v177_v9 = vsel %vm176_vm6, %v3931_v14, 0 }
  0xb5   :  { %v520_v6 = vsel %vm510_vm9, %v517_v57, %v519_v3  ;;  %v523_v8 = vsel %vm511_vm10, %v505_v61, %v522_v4  ;;  %v434_v15 = vadd.s32 536870912, %v433_v1  ;;  %v516_v45 = vsel %vm510_vm9, %v513_v2, %v515_v5 }
  0xb6   :  { %v524_v16 = vsel %vm510_vm9, %v521_v0, %v523_v8  ;;  %v3990_v25 = vmul.u32.u64.low %v3928_v12, %v520_v6  ;;  %v3991_v31 = vmul.u32.u64.high %v3928_v12, %v520_v6, %v3990_v25  ;;  %v172_v46 = vand.u32 8388607, %v165_v13 }
  0xb7   :  { %v3994_v42 = vmul.u32.u64.low %v3928_v12, %v524_v16  ;;  %v3995_v43 = vmul.u32.u64.high %v3928_v12, %v524_v16, %v3994_v42  ;;  %v435_v44 = vshrl.u32 %v434_v15, 30  ;;  %v179_v14 = vand.u32 31, %v177_v9 }
  0xb8   :  { %v272_v7 = vand.u32 2139095040, %v3924_v10  ;;  %v535_v54 = vadd.s32 1, %v3991_v31  ;;  %v532_v55 = vmul.u32 %v3928_v12, %v516_v45  ;;  %v173_v59 = vor.u32 8388608, %v172_v46 }
  0xb9   :  { %v436_v52 = vshll.u32 %v435_v44, 30  ;;  %vm534_vm12 = vc.u32 %v3995_v43, %v3990_v25  ;;  %v269_v18 = vand.u32 2147483647, %v3924_v10  ;;  %v180_v61 = vsub.s32 32, %v179_v14 }
  0xba   :  { %v536_v58 = vsel %vm534_vm12, %v535_v54, %v3991_v31  ;;  %v273_v62 = vshrl.u32 %v272_v7, 23  ;;  %v4010_v11 = vshrl.u32 %v177_v9, 5  ;;  %v4014_v21 = vshll.u32 %v173_v59, 8 }
  0xbb   :  { %v4005_v56 = vsub.s32 %v433_v1, %v436_v52  ;;  %v537_v60 = vadd.s32 %v536_v58, %v532_v55  ;;  %v4018_v0 = vand.u32 8388607, %v269_v18  ;;  %v429_v1 = vadd.s32 %v3962_v41, %v3959_v33 }
  0xbc   :  { %v189_v3 = vshrl.u32 %v3826_v32, %v180_v61  ;;  %v3530_v4 = vadd.s32 4294967169, %v273_v62  ;;  %v183_v8 = vshrl.u32 %v3824_v22, %v180_v61  ;;  %v186_v9 = vshrl.u32 %v3825_v26, %v180_v61 }
  0xbd   :  { %v439_v57 = vsub.s32 0, %v4005_v56  ;;  %v538_v63 = vadd.s32 536870912, %v537_v60  ;;  %vm197_vm15 = vcmp.lt.s32.totalorder %v4010_v11, 1  ;;  %v459_v15 = vsub.s32 4, %v435_v44 }
  0xbe   :  { %v188_v41 = vshll.u32 %v3825_v26, %v179_v14  ;;  %v192_v16 = vshrl.u32 %v3827_v40, %v180_v61  ;;  %vm199_vm0 = vcmp.lt.s32.totalorder %v4010_v11, 3  ;;  %v182_v31 = vshll.u32 %v3823_v17, %v179_v14 }
  0xbf   :  { %v3535_v12 = vmin.u32 %v439_v57, %v4005_v56  ;;  %v4022_v2 = vshrl.u32 %v538_v63, 30  ;;  %v185_v42 = vshll.u32 %v3824_v22, %v179_v14  ;;  %v191_v45 = vshll.u32 %v3826_v32, %v179_v14 }
  0xc0   :  { %vm198_vm1 = vcmp.lt.s32.totalorder %v4010_v11, 2  ;;  %v190_v7 = vor.u32 %v189_v3, %v188_v41  ;;  %v195_v52 = vshrl.u32 %v3828_v47, %v180_v61  ;;  %vm200_vm2 = vcmp.lt.s32.totalorder %v4010_v11, 4 }
  0xc1   :  { %v441_v6 = vclz %v3535_v12  ;;  %v540_v33 = vshll.u32 %v4022_v2, 30  ;;  %v184_v54 = vor.u32 %v183_v8, %v182_v31  ;;  %v187_v55 = vor.u32 %v186_v9, %v185_v42 }
  0xc2   :  { %v193_v58 = vor.u32 %v192_v16, %v191_v45  ;;  %v533_v62 = vadd.s32 %v3990_v25, %v3995_v43  ;;  %v194_v63 = vshll.u32 %v3827_v40, %v179_v14  ;;  %v181_v3 = vshrl.u32 %v3823_v17, %v180_v61 }
  0xc3   :  { %v3536_v51 = vadd.s32 4294967294, %v441_v6  ;;  %v4042_v46 = vsub.s32 %v537_v60, %v540_v33  ;;  %v460_v60 = vsel %vm375_vm13, %v459_v15, %v435_v44  ;;  %vm479_vm4 = vcmp.lt.s32.totalorder %v3910_v49, 0 }
  0xc4   :  { %v196_v9 = vor.u32 %v195_v52, %v194_v63  ;;  %v202_v25 = vsel %vm200_vm2, %v190_v7, 2102212464  ;;  %v205_v14 = vsel %vm197_vm15, %v184_v54, %v187_v55  ;;  %v206_v44 = vsel %vm200_vm2, %v193_v58, 920167782 }
  0xc5   :  { %vm3537_vm3 = vcmp.lt.s32.totalorder %v3536_v51, 0  ;;  %v543_v57 = vsub.s32 0, %v4042_v46  ;;  %v462_v61 = vsel %vm4027_vm14, 0, %v460_v60  ;;  %v563_v15 = vsub.s32 4, %v4022_v2 }
  0xc6   :  { %v444_v59 = vsel %vm3537_vm3, 0, %v3536_v51  ;;  %v201_v16 = vsel %vm197_vm15, %v181_v3, %v184_v54  ;;  %vm4068_vm5 = vcmp.le.f32.partialorder %v477_v53, 0.7853982  ;;  %v207_v42 = vsel %vm199_vm0, %v190_v7, %v206_v44 }
  0xc7   :  { %v445_v12 = vsub.s32 32, %v444_v59  ;;  %v449_v6 = vsub.s32 4294967266, %v444_v59  ;;  %v446_v33 = vshll.u32 %v4005_v56, %v444_v59  ;;  %v3539_v8 = vmin.u32 %v543_v57, %v4042_v46 }
  0xc8   :  { %v209_v45 = vsel %vm197_vm15, %v187_v55, %v190_v7  ;;  %v203_v59 = vsel %vm199_vm0, %v187_v55, %v202_v25  ;;  %v208_v54 = vsel %vm198_vm1, %v205_v14, %v207_v42  ;;  %v210_v57 = vsel %vm200_vm2, %v196_v9, 1326507024 }
  0xc9   :  { %v447_v43 = vshrl.u32 %v429_v1, %v445_v12  ;;  %v450_v41 = vadd.s32 127, %v449_v6  ;;  %v545_v56 = vclz %v3539_v8  ;;  %v211_v12 = vsel %vm199_vm0, %v193_v58, %v210_v57 }
  0xca   :  { %v279_v6 = vadd.s32 1, %v3530_v4  ;;  %v212_v7 = vsel %vm198_vm1, %v209_v45, %v211_v12  ;;  %v4087_v60 = vmul.u32.u64.low %v4014_v21, %v208_v54  ;;  %v4088_v3 = vmul.u32.u64.high %v4014_v21, %v208_v54, %v4087_v60 }
  0xcb   :  { %v448_v51 = vor.u32 %v447_v43, %v446_v33  ;;  %v451_v31 = vshll.u32 %v450_v41, 23  ;;  %v3540_v52 = vadd.s32 4294967294, %v545_v56  ;;  %v204_v4 = vsel %vm198_vm1, %v201_v16, %v203_v59 }
  0xcc   :  { %v4092_v8 = vmul.u32.u64.low %v4014_v21, %v212_v7  ;;  %v4093_v9 = vmul.u32.u64.high %v4014_v21, %v212_v7, %v4092_v8  ;;  %vm280_vm7 = vcmp.gt.s32.totalorder %v279_v6, 0  ;;  %v466_v41 = vadd.s32 3, %v462_v61 }
  0xcd   :  { %v452_v53 = vor.u32 4788187, %v451_v31  ;;  %v455_v63 = vcvt.s32.f32 %v448_v51  ;;  %vm3541_vm6 = vcmp.lt.s32.totalorder %v3540_v52, 0  ;;  %v564_v14 = vsel %vm479_vm4, %v563_v15, %v4022_v2 }
  0xce   :  { %v548_v33 = vsel %vm3541_vm6, 0, %v3540_v52  ;;  %v281_v44 = vsel %vm280_vm7, %v279_v6, 0  ;;  %v223_v42 = vadd.s32 1, %v4088_v3  ;;  %v220_v52 = vmul.u32 %v4014_v21, %v204_v4 }
  0xcf   :  { %v453_v55 = vand.u32 2147483647, %v452_v53  ;;  %v549_v25 = vsub.s32 32, %v548_v33  ;;  %v553_v43 = vsub.s32 4294967266, %v548_v33  ;;  %v550_v56 = vshll.u32 %v4042_v46, %v548_v33 }
  0xd0   :  { %vm222_vm8 = vc.u32 %v4093_v9, %v4087_v60  ;;  %v283_v11 = vand.u32 31, %v281_v44  ;;  %v566_v54 = vsel %vm4068_vm5, 0, %v564_v14  ;;  %v277_v15 = vor.u32 8388608, %v4018_v0 }
  0xd1   :  { %v456_v58 = vmul.f32 %v455_v63, %v453_v55  ;;  %v551_v51 = vshrl.u32 %v533_v62, %v549_v25  ;;  %v554_v31 = vadd.s32 127, %v553_v43  ;;  %v224_v2 = vsel %vm222_vm8, %v223_v42, %v4088_v3 }
  0xd2   :  { %v225_v62 = vadd.s32 %v224_v2, %v220_v52  ;;  %v284_v57 = vsub.s32 32, %v283_v11  ;;  %v4114_v53 = vand.u32 3, %v466_v41  ;;  %v4116_v12 = vand.u32 3, %v462_v61 }
  0xd3   :  { %v457_v45 = vxor.u32 2147483648, %v456_v58  ;;  %v552_v16 = vor.u32 %v551_v51, %v550_v56  ;;  %v555_v59 = vshll.u32 %v554_v31, 23  ;;  %v570_v6 = vadd.s32 3, %v566_v54 }
  0xd4   :  { %v4118_v7 = vand.u32 3, %v566_v54  ;;  %v226_v3 = vadd.s32 536870912, %v225_v62  ;;  %v4120_v8 = vshrl.u32 %v281_v44, 5  ;;  %v287_v5 = vshrl.u32 %v3824_v22, %v284_v57 }
  0xd5   :  { %v458_v46 = vsel %vm375_vm13, %v457_v45, %v456_v58  ;;  %v556_v63 = vor.u32 4788187, %v555_v59  ;;  %v559_v33 = vcvt.s32.f32 %v552_v16  ;;  %v290_v25 = vshrl.u32 %v3825_v26, %v284_v57 }
  0xd6   :  { %v461_v21 = vsel %vm4027_vm14, %v3908_v48, %v458_v46  ;;  %v4122_v0 = vshrl.u32 %v226_v3, 30  ;;  %v293_v43 = vshrl.u32 %v3826_v32, %v284_v57  ;;  %v286_v4 = vshll.u32 %v3823_v17, %v283_v11 }
  0xd7   :  { %3733 = vcosq.f32 %v461_v21  ;;  %v557_v55 = vand.u32 2147483647, %v556_v63  ;;  %v295_v58 = vshll.u32 %v3826_v32, %v283_v11  ;;  %v296_v41 = vshrl.u32 %v3827_v40, %v284_v57 }
  0xd8   :  { %3735 = vsinq.f32 %v461_v21  ;;  %vm472_vm9 = vcmp.eq.s32.totalorder %v4114_v53, 2  ;;  %vm2149_vm10 = vcmp.eq.s32.totalorder %v4116_v12, 2  ;;  %v228_v14 = vshll.u32 %v4122_v0, 30 }
  0xd9   :  { %v560_v61 = vmul.f32 %v559_v33, %v557_v55  ;;  %v289_v44 = vshll.u32 %v3824_v22, %v283_v11  ;;  %v292_v56 = vshll.u32 %v3825_v26, %v283_v11  ;;  %v299_v51 = vshrl.u32 %v3828_v47, %v284_v57 }
  0xda   :  { %vm469_vm11 = vcmp.eq.s32.totalorder %v4114_v53, 0  ;;  %v4137_v42 = vand.u32 3, %v570_v6  ;;  %vm2146_vm12 = vcmp.eq.s32.totalorder %v4116_v12, 0  ;;  %v297_v45 = vor.u32 %v296_v41, %v295_v58 }
  0xdb   :  { %v561_v31 = vxor.u32 2147483648, %v560_v61  ;;  %v298_v52 = vshll.u32 %v3827_v40, %v283_v11  ;;  %vm468_vm13 = vcmp.lt.s32.totalorder %v4114_v53, 2  ;;  %vm2145_vm14 = vcmp.lt.s32.totalorder %v4116_v12, 2 }
  0xdc   :  { %v4143_v16 = vsub.s32 %v225_v62, %v228_v14  ;;  %v288_v59 = vor.u32 %v287_v5, %v286_v4  ;;  %v291_v54 = vor.u32 %v290_v25, %v289_v44  ;;  %v294_v2 = vor.u32 %v293_v43, %v292_v56 }
  0xdd   :  { %vm465_vm15 = vweird.f32 %v3908_v48  ;;  %v562_v46 = vsel %vm479_vm4, %v561_v31, %v560_v61  ;;  %v300_v21 = vor.u32 %v299_v51, %v298_v52  ;;  %vm301_vm0 = vcmp.lt.s32.totalorder %v4120_v8, 1 }
  0xde   :  { %v4149_v63 = vshll.u32 %v277_v15, 8  ;;  %v565_v11 = vsel %vm4068_vm5, %v3910_v49, %v562_v46  ;;  %v231_v62 = vsub.s32 0, %v4143_v16  ;;  %v285_v6 = vshrl.u32 %v3823_v17, %v284_v57 }
  0xdf   :  { %vm304_vm1 = vcmp.lt.s32.totalorder %v4120_v8, 4  ;;  %3737 = vcosq.f32 %v565_v11  ;;  %v251_v3 = vsub.s32 4, %v4122_v0  ;;  %vm303_vm2 = vcmp.lt.s32.totalorder %v4120_v8, 3 }
  0xe0   :  { %v310_v55 = vsel %vm304_vm1, %v297_v45, 920167782  ;;  %3739 = vsinq.f32 %v565_v11  ;;  %vm167_vm3 = vcmp.lt.s32.totalorder %v3912_v50, 0  ;;  %v3527_v1 = vmin.u32 %v231_v62, %v4143_v16 }
  0xe1   :  { %v3734_v15 = vpop.eup %3733  ;;  %v309_v33 = vsel %vm301_vm0, %v288_v59, %v291_v54  ;;  %v311_v57 = vsel %vm303_vm2, %v294_v2, %v310_v55  ;;  %vm302_vm4 = vcmp.lt.s32.totalorder %v4120_v8, 2  ;;  %v313_v43 = vsel %vm301_vm0, %v291_v54, %v294_v2 }
  0xe2   :  { %v3736_v5 = vpop.eup %3735  ;;  %v473_v25 = vxor.u32 2147483648, %v3734_v15  ;;  %v314_v61 = vsel %vm304_vm1, %v300_v21, 1326507024  ;;  %v233_v58 = vclz %v3527_v1  ;;  %v305_v41 = vsel %vm301_vm0, %v285_v6, %v288_v59  ;;  %v111_v6 = vpop.permute.xlu1 %110 }
  0xe3   :  { %v470_v4 = vxor.u32 2147483648, %v3736_v5  ;;  %v306_v14 = vsel %vm304_vm1, %v294_v2, 2102212464  ;;  %vm2252_vm5 = vcmp.eq.s32.totalorder %v4118_v7, 2  ;;  %v312_v51 = vsel %vm302_vm4, %v309_v33, %v311_v57 }
  0xe4   :  { %v474_v44 = vsel %vm472_vm9, %v473_v25, %v3736_v5  ;;  %v2151_v56 = vsel %vm2149_vm10, %v473_v25, %v3736_v5  ;;  %v315_v31 = vsel %vm303_vm2, %v297_v45, %v314_v61  ;;  %vm2249_vm6 = vcmp.eq.s32.totalorder %v4118_v7, 0 }
  0xe5   :  { %v471_v52 = vsel %vm469_vm11, %v3734_v15, %v470_v4  ;;  %v2148_v59 = vsel %vm2146_vm12, %v3734_v15, %v470_v4  ;;  %v3528_v2 = vadd.s32 4294967294, %v233_v58  ;;  %v316_v46 = vsel %vm302_vm4, %v313_v43, %v315_v31 }
  0xe6   :  { %v475_v21 = vsel %vm468_vm13, %v471_v52, %v474_v44  ;;  %vm572_vm7 = vcmp.lt.s32.totalorder %v4137_v42, 2  ;;  %v2152_v45 = vsel %vm2145_vm14, %v2148_v59, %v2151_v56  ;;  %vm2248_vm8 = vcmp.lt.s32.totalorder %v4118_v7, 2 }
  0xe7   :  { %v4199_v11 = vmul.u32.u64.low %v4149_v63, %v316_v46  ;;  %v4200_v62 = vmul.u32.u64.high %v4149_v63, %v316_v46, %v4199_v11  ;;  %v476_v55 = vsel %vm465_vm15, nan, %v475_v21  ;;  %vm569_vm9 = vweird.f32 %v3910_v49 }
  0xe8   :  { %v2153_v53 = vsel %vm465_vm15, nan, %v2152_v45  ;;  %vm3529_vm10 = vcmp.lt.s32.totalorder %v3528_v2, 0  ;;  %v307_v12 = vsel %vm303_vm2, %v291_v54, %v306_v14  ;;  %vm573_vm11 = vcmp.eq.s32.totalorder %v4137_v42, 0  ;;  %1831 = vst [vmem:[#allocation2 + $0x10] sm:$0xff] %v476_v55 }
  0xe9   :  { %3495 = vst [vmem:[#allocation2 + $0x90] sm:$0xff] %v2153_v53  ;;  %v236_v15 = vsel %vm3529_vm10, 0, %v3528_v2  ;;  %v4211_v1 = vmul.u32.u64.low %v4149_v63, %v312_v51  ;;  %v4212_v33 = vmul.u32.u64.high %v4149_v63, %v312_v51, %v4211_v1  ;;  %v221_v57 = vadd.s32 %v4087_v60, %v4093_v9  ;;  %v3738_v43 = vpop.eup %3737 }
  0xea   :  { %v237_v5 = vsub.s32 32, %v236_v15  ;;  %v241_v48 = vsub.s32 4294967266, %v236_v15  ;;  %v137_v25 = vmul.f32 %v111_v6, %v3901_v38  ;;  %vm576_vm12 = vcmp.eq.s32.totalorder %v4137_v42, 2  ;;  %v3740_v58 = vpop.eup %3739 }
  0xeb   :  { %v238_v54 = vshll.u32 %v4143_v16, %v236_v15  ;;  %v252_v61 = vsel %vm167_vm3, %v251_v3, %v4122_v0  ;;  %v308_v4 = vsel %vm302_vm4, %v305_v41, %v307_v12  ;;  %v577_v14 = vxor.u32 2147483648, %v3738_v43 }
  0xec   :  { %v239_v44 = vshrl.u32 %v221_v57, %v237_v5  ;;  %v242_v60 = vadd.s32 127, %v241_v48  ;;  %vm326_vm13 = vc.u32 %v4200_v62, %v4211_v1  ;;  %v574_v9 = vxor.u32 2147483648, %v3740_v58 }
  0xed   :  { %v327_v56 = vadd.s32 1, %v4212_v33  ;;  %v138_v51 = vmul.f32 %v111_v6, %v3903_v39  ;;  %v4230_v16 = vadd.f32 %v137_v25, %v3874_v19  ;;  %v578_v31 = vsel %vm576_vm12, %v577_v14, %v3740_v58 }
  0xee   :  { %v2254_v8 = vsel %vm2252_vm5, %v577_v14, %v3740_v58  ;;  %v240_v0 = vor.u32 %v239_v44, %v238_v54  ;;  %v243_v3 = vshll.u32 %v242_v60, 23  ;;  %v575_v41 = vsel %vm573_vm11, %v3738_v43, %v574_v9 }
  0xef   :  { %v2251_v52 = vsel %vm2249_vm6, %v3738_v43, %v574_v9  ;;  %v324_v59 = vmul.u32 %v4149_v63, %v308_v4  ;;  %v328_v2 = vsel %vm326_vm13, %v327_v56, %v4212_v33  ;;  %v579_v19 = vsel %vm572_vm7, %v575_v41, %v578_v31 }
  0xf0   :  { %v2255_v46 = vsel %vm2248_vm8, %v2251_v52, %v2254_v8  ;;  %v244_v21 = vor.u32 4788187, %v243_v3  ;;  %v4245_v45 = vadd.f32 %v138_v51, %v3876_v20  ;;  %v580_v11 = vsel %vm569_vm9, nan, %v579_v19 }
  0xf1   :  { %v2256_v6 = vsel %vm569_vm9, nan, %v2255_v46  ;;  %vm4253_vm14 = vcmp.le.f32.partialorder %v165_v13, 0.7853982  ;;  %v329_v42 = vadd.s32 %v328_v2, %v324_v59  ;;  %1832 = vst [vmem:[#allocation2 + $0x18] sm:$0xff] %v580_v11  ;;  %v247_v55 = vcvt.s32.f32 %v240_v0 }
  0xf2   :  { %3496 = vst [vmem:[#allocation2 + $0x98] sm:$0xff] %v2256_v6  ;;  %v245_v7 = vand.u32 2147483647, %v244_v21  ;;  %v254_v20 = vsel %vm4253_vm14, 0, %v252_v61  ;;  %v584_v53 = vand.u32 2139095040, %v4230_v16  ;;  %v688_v13 = vand.u32 2139095040, %v4245_v45 }
  0xf3   :  { %v330_v12 = vadd.s32 536870912, %v329_v42  ;;  %v581_v49 = vand.u32 2147483647, %v4230_v16  ;;  %v258_v57 = vadd.s32 3, %v254_v20  ;;  %v4273_v51 = vand.u32 3, %v254_v20 }
  0xf4   :  { %v248_v15 = vmul.f32 %v247_v55, %v245_v7  ;;  %v585_v33 = vshrl.u32 %v584_v53, 23  ;;  %v689_v43 = vshrl.u32 %v688_v13, 23  ;;  %v685_v3 = vand.u32 2147483647, %v4245_v45 }
  0xf5   :  { %v331_v5 = vshrl.u32 %v330_v12, 30  ;;  %v588_v4 = vand.u32 8388607, %v581_v49  ;;  %v4269_v60 = vand.u32 3, %v258_v57  ;;  %vm271_vm0 = vcmp.lt.s32.totalorder %v3924_v10, 0 }
  0xf6   :  { %v249_v48 = vxor.u32 2147483648, %v248_v15  ;;  %v3542_v25 = vadd.s32 4294967169, %v585_v33  ;;  %v3546_v14 = vadd.s32 4294967169, %v689_v43  ;;  %vm4280_vm1 = vcmp.le.f32.partialorder %v269_v18, 0.7853982 }
  0xf7   :  { %v332_v54 = vshll.u32 %v331_v5, 30  ;;  %v355_v56 = vsub.s32 4, %v331_v5  ;;  %v589_v0 = vor.u32 8388608, %v588_v4  ;;  %v325_v19 = vadd.s32 %v4211_v1, %v4200_v62 }
  0xf8   :  { %v250_v61 = vsel %vm167_vm3, %v249_v48, %v248_v15  ;;  %v591_v58 = vadd.s32 1, %v3542_v25  ;;  %v695_v31 = vadd.s32 1, %v3546_v14  ;;  %vm264_vm3 = vcmp.eq.s32.totalorder %v4269_v60, 2 }
  0xf9   :  { %v253_v44 = vsel %vm4253_vm14, %v3912_v50, %v250_v61  ;;  %v4271_v9 = vsub.s32 %v329_v42, %v332_v54  ;;  %v356_v2 = vsel %vm271_vm0, %v355_v56, %v331_v5  ;;  %vm1943_vm4 = vcmp.eq.s32.totalorder %v4273_v51, 2 }
  0xfa   :  { %3741 = vcosq.f32 %v253_v44  ;;  %vm592_vm15 = vcmp.gt.s32.totalorder %v591_v58, 0  ;;  %vm696_vm2 = vcmp.gt.s32.totalorder %v695_v31, 0  ;;  %vm261_vm5 = vcmp.eq.s32.totalorder %v4269_v60, 0 }
  0xfb   :  { %3743 = vsinq.f32 %v253_v44  ;;  %v335_v8 = vsub.s32 0, %v4271_v9  ;;  %v593_v41 = vsel %vm592_vm15, %v591_v58, 0  ;;  %vm1940_vm6 = vcmp.eq.s32.totalorder %v4273_v51, 0 }
  0xfc   :  { %v595_v46 = vand.u32 31, %v593_v41  ;;  %v4293_v21 = vshrl.u32 %v593_v41, 5  ;;  %v4295_v11 = vshll.u32 %v589_v0, 8  ;;  %v4299_v6 = vand.u32 8388607, %v685_v3 }
  0xfd   :  { %v3531_v59 = vmin.u32 %v335_v8, %v4271_v9  ;;  %vm260_vm7 = vcmp.lt.s32.totalorder %v4269_v60, 2  ;;  %v4304_v62 = vsel %vm4280_vm1, 0, %v356_v2  ;;  %vm1939_vm8 = vcmp.lt.s32.totalorder %v4273_v51, 2 }
  0xfe   :  { %v596_v1 = vsub.s32 32, %v595_v46  ;;  %v598_v63 = vshll.u32 %v3823_v17, %v595_v46  ;;  %v4309_v42 = vsel %vm696_vm2, %v695_v31, 0  ;;  %vm257_vm9 = vweird.f32 %v3912_v50 }
  0xff   :  { %v337_v18 = vclz %v3531_v59  ;;  %v601_v55 = vshll.u32 %v3824_v22, %v595_v46  ;;  %v604_v20 = vshll.u32 %v3825_v26, %v595_v46  ;;  %v607_v53 = vshll.u32 %v3826_v32, %v595_v46 }
 0x100   :  { %v599_v12 = vshrl.u32 %v3824_v22, %v596_v1  ;;  %v602_v15 = vshrl.u32 %v3825_v26, %v596_v1  ;;  %v605_v33 = vshrl.u32 %v3826_v32, %v596_v1  ;;  %v610_v13 = vshll.u32 %v3827_v40, %v595_v46 }
 0x101   :  { %v3532_v7 = vadd.s32 4294967294, %v337_v18  ;;  %v608_v57 = vshrl.u32 %v3827_v40, %v596_v1  ;;  %v611_v5 = vshrl.u32 %v3828_v47, %v596_v1  ;;  %vm613_vm11 = vcmp.lt.s32.totalorder %v4293_v21, 1 }
 0x102   :  { %v597_v43 = vshrl.u32 %v3823_v17, %v596_v1  ;;  %v600_v54 = vor.u32 %v599_v12, %v598_v63  ;;  %v603_v4 = vor.u32 %v602_v15, %v601_v55  ;;  %v606_v56 = vor.u32 %v605_v33, %v604_v20 }
 0x103   :  { %vm3533_vm10 = vcmp.lt.s32.totalorder %v3532_v7, 0  ;;  %v609_v0 = vor.u32 %v608_v57, %v607_v53  ;;  %v612_v41 = vor.u32 %v611_v5, %v610_v13  ;;  %vm615_vm12 = vcmp.lt.s32.totalorder %v4293_v21, 3 }
 0x104   :  { %v3742_v48 = vpop.eup %3741  ;;  %v340_v25 = vsel %vm3533_vm10, 0, %v3532_v7  ;;  %vm616_vm13 = vcmp.lt.s32.totalorder %v4293_v21, 4  ;;  %v621_v15 = vsel %vm613_vm11, %v600_v54, %v603_v4  ;;  %v617_v60 = vsel %vm613_vm11, %v597_v43, %v600_v54 }
 0x105   :  { %v3744_v61 = vpop.eup %3743  ;;  %v265_v58 = vxor.u32 2147483648, %v3742_v48  ;;  %v341_v14 = vsub.s32 32, %v340_v25  ;;  %v345_v44 = vsub.s32 4294967266, %v340_v25  ;;  %v342_v8 = vshll.u32 %v4271_v9, %v340_v25 }
 0x106   :  { %v262_v31 = vxor.u32 2147483648, %v3744_v61  ;;  %v618_v12 = vsel %vm616_vm13, %v606_v56, 2102212464  ;;  %v622_v13 = vsel %vm616_vm13, %v609_v0, 920167782  ;;  %vm614_vm14 = vcmp.lt.s32.totalorder %v4293_v21, 2 }
 0x107   :  { %v266_v59 = vsel %vm264_vm3, %v265_v58, %v3744_v61  ;;  %v343_v2 = vshrl.u32 %v325_v19, %v341_v14  ;;  %v346_v46 = vadd.s32 127, %v345_v44  ;;  %v1945_v18 = vsel %vm1943_vm4, %v265_v58, %v3744_v61  ;;  %v4361_v61 = vpop.permute.xlu0 %114 }
 0x108   :  { %v263_v1 = vsel %vm261_vm5, %v3742_v48, %v262_v31  ;;  %v1942_v63 = vsel %vm1940_vm6, %v3742_v48, %v262_v31  ;;  %v619_v51 = vsel %vm615_vm12, %v603_v4, %v618_v12  ;;  %v623_v50 = vsel %vm615_vm12, %v606_v56, %v622_v13 }
 0x109   :  { %v267_v9 = vsel %vm260_vm7, %v263_v1, %v266_v59  ;;  %v344_v7 = vor.u32 %v343_v2, %v342_v8  ;;  %v347_v55 = vshll.u32 %v346_v46, 23  ;;  %v1946_v19 = vsel %vm1939_vm8, %v1942_v63, %v1945_v18 }
 0x10a   :  { %v268_v20 = vsel %vm257_vm9, nan, %v267_v9  ;;  %v1947_v53 = vsel %vm257_vm9, nan, %v1946_v19  ;;  %v625_v57 = vsel %vm613_vm11, %v603_v4, %v606_v56  ;;  %v626_v5 = vsel %vm616_vm13, %v612_v41, 1326507024 }
 0x10b   :  { %v348_v33 = vor.u32 4788187, %v347_v55  ;;  %1829 = vst [vmem:[#allocation2] sm:$0xff] %v268_v20  ;;  %3493 = vst [vmem:[#allocation2 + $0x80] sm:$0xff] %v1947_v53  ;;  %v351_v25 = vcvt.s32.f32 %v344_v7  ;;  %v624_v43 = vsel %vm614_vm14, %v621_v15, %v623_v50  ;;  %v627_v54 = vsel %vm615_vm12, %v609_v0, %v626_v5 }
 0x10c   :  { %v620_v58 = vsel %vm614_vm14, %v617_v60, %v619_v51  ;;  %v628_v14 = vsel %vm614_vm14, %v625_v57, %v627_v54  ;;  %v4364_v44 = vmul.u32.u64.low %v4295_v11, %v624_v43  ;;  %v4365_v31 = vmul.u32.u64.high %v4295_v11, %v624_v43, %v4364_v44 }
 0x10d   :  { %v349_v48 = vand.u32 2147483647, %v348_v33  ;;  %v4369_v4 = vmul.u32.u64.low %v4295_v11, %v628_v14  ;;  %v4370_v56 = vmul.u32.u64.high %v4295_v11, %v628_v14, %v4369_v4  ;;  %v699_v41 = vand.u32 31, %v4309_v42 }
 0x10e   :  { %v362_v59 = vadd.s32 3, %v4304_v62  ;;  %v4375_v21 = vand.u32 3, %v4304_v62  ;;  %v693_v0 = vor.u32 8388608, %v4299_v6  ;;  %v139_v2 = vmul.f32 %v4361_v61, %v3901_v38 }
 0x10f   :  { %v352_v8 = vmul.f32 %v351_v25, %v349_v48  ;;  %v636_v18 = vmul.u32 %v4295_v11, %v620_v58  ;;  %v4382_v1 = vshrl.u32 %v4309_v42, 5  ;;  %v700_v63 = vsub.s32 32, %v699_v41 }
 0x110   :  { %v639_v9 = vadd.s32 1, %v4365_v31  ;;  %v702_v7 = vshll.u32 %v3823_v17, %v699_v41  ;;  %v705_v55 = vshll.u32 %v3824_v22, %v699_v41  ;;  %v708_v62 = vshll.u32 %v3825_v26, %v699_v41 }
 0x111   :  { %v353_v46 = vxor.u32 2147483648, %v352_v8  ;;  %vm638_vm15 = vc.u32 %v4370_v56, %v4364_v44  ;;  %v711_v11 = vshll.u32 %v3826_v32, %v699_v41  ;;  %v714_v42 = vshll.u32 %v3827_v40, %v699_v41 }
 0x112   :  { %v640_v20 = vsel %vm638_vm15, %v639_v9, %v4365_v31  ;;  %v703_v53 = vshrl.u32 %v3824_v22, %v700_v63  ;;  %v706_v12 = vshrl.u32 %v3825_v26, %v700_v63  ;;  %v709_v33 = vshrl.u32 %v3826_v32, %v700_v63 }
 0x113   :  { %v354_v6 = vsel %vm271_vm0, %v353_v46, %v352_v8  ;;  %v641_v15 = vadd.s32 %v640_v20, %v636_v18  ;;  %v712_v60 = vshrl.u32 %v3827_v40, %v700_v63  ;;  %v715_v50 = vshrl.u32 %v3828_v47, %v700_v63 }
 0x114   :  { %v357_v19 = vsel %vm4280_vm1, %v3924_v10, %v354_v6  ;;  %v704_v51 = vor.u32 %v703_v53, %v702_v7  ;;  %v707_v13 = vor.u32 %v706_v12, %v705_v55  ;;  %v710_v52 = vor.u32 %v709_v33, %v708_v62 }
 0x115   :  { %3745 = vcosq.f32 %v357_v19  ;;  %v642_v57 = vadd.s32 536870912, %v641_v15  ;;  %v713_v5 = vor.u32 %v712_v60, %v711_v11  ;;  %vm717_vm0 = vcmp.lt.s32.totalorder %v4382_v1, 1 }
 0x116   :  { %3747 = vsinq.f32 %v357_v19  ;;  %v716_v48 = vor.u32 %v715_v50, %v714_v42  ;;  %vm720_vm1 = vcmp.lt.s32.totalorder %v4382_v1, 4  ;;  %v725_v25 = vsel %vm717_vm0, %v704_v51, %v707_v13 }
 0x117   :  { %v733_v43 = vshll.u32 %v693_v0, 8  ;;  %v643_v54 = vshrl.u32 %v642_v57, 30  ;;  %vm719_vm2 = vcmp.lt.s32.totalorder %v4382_v1, 3  ;;  %v726_v58 = vsel %vm720_vm1, %v713_v5, 920167782 }
 0x118   :  { %v4409_v14 = vadd.f32 %v139_v2, %v3878_v23  ;;  %vm718_vm3 = vcmp.lt.s32.totalorder %v4382_v1, 2  ;;  %v727_v31 = vsel %vm719_vm2, %v710_v52, %v726_v58  ;;  %v729_v8 = vsel %vm717_vm0, %v707_v13, %v710_v52 }
 0x119   :  { %v730_v4 = vsel %vm720_vm1, %v716_v48, 1326507024  ;;  %v644_v41 = vshll.u32 %v643_v54, 30  ;;  %v701_v46 = vshrl.u32 %v3823_v17, %v700_v63  ;;  %v722_v0 = vsel %vm720_vm1, %v710_v52, 2102212464 }
 0x11a   :  { %v728_v18 = vsel %vm718_vm3, %v725_v25, %v727_v31  ;;  %vm361_vm4 = vweird.f32 %v3924_v10  ;;  %v363_v23 = vand.u32 3, %v362_v59  ;;  %v731_v2 = vsel %vm719_vm2, %v713_v5, %v730_v4 }
 0x11b   :  { %v4422_v9 = vmul.u32.u64.low %v733_v43, %v728_v18  ;;  %v4423_v7 = vmul.u32.u64.high %v733_v43, %v728_v18, %v4422_v9  ;;  %vm583_vm5 = vcmp.lt.s32.totalorder %v4230_v16, 0  ;;  %v4427_v55 = vsub.s32 %v641_v15, %v644_v41 }
 0x11c   :  { %v721_v63 = vsel %vm717_vm0, %v701_v46, %v704_v51  ;;  %v732_v62 = vsel %vm718_vm3, %v729_v8, %v731_v2  ;;  %v140_v59 = vmul.f32 %v4361_v61, %v3903_v39  ;;  %v723_v6 = vsel %vm719_vm2, %v707_v13, %v722_v0 }
 0x11d   :  { %v4437_v11 = vmul.u32.u64.low %v733_v43, %v732_v62  ;;  %v4438_v42 = vmul.u32.u64.high %v733_v43, %v732_v62, %v4437_v11  ;;  %v792_v19 = vand.u32 2139095040, %v4409_v14  ;;  %vm2042_vm6 = vcmp.lt.s32.totalorder %v4375_v21, 2 }
 0x11e   :  { %vm2043_vm7 = vcmp.eq.s32.totalorder %v4375_v21, 0  ;;  %vm2046_vm8 = vcmp.eq.s32.totalorder %v4375_v21, 2  ;;  %v647_v53 = vsub.s32 0, %v4427_v55  ;;  %vm365_vm9 = vcmp.eq.s32.totalorder %v363_v23, 0 }
 0x11f   :  { %v3746_v20 = vpop.eup %3745  ;;  %vm368_vm10 = vcmp.eq.s32.totalorder %v363_v23, 2  ;;  %v667_v15 = vsub.s32 4, %v643_v54  ;;  %v724_v51 = vsel %vm718_vm3, %v721_v63, %v723_v6  ;;  %v743_v13 = vadd.s32 1, %v4423_v7 }
 0x120   :  { %v3748_v12 = vpop.eup %3747  ;;  %v369_v61 = vxor.u32 2147483648, %v3746_v20  ;;  %v3543_v60 = vmin.u32 %v647_v53, %v4427_v55  ;;  %vm742_vm11 = vc.u32 %v4438_v42, %v4422_v9  ;;  %v793_v52 = vshrl.u32 %v792_v19, 23 }
 0x121   :  { %v366_v33 = vxor.u32 2147483648, %v3748_v12  ;;  %vm364_vm12 = vcmp.lt.s32.totalorder %v363_v23, 2  ;;  %v740_v1 = vmul.u32 %v733_v43, %v724_v51  ;;  %v789_v8 = vand.u32 2147483647, %v4409_v14 }
 0x122   :  { %v370_v50 = vsel %vm368_vm10, %v369_v61, %v3748_v12  ;;  %v2048_v57 = vsel %vm2046_vm8, %v369_v61, %v3748_v12  ;;  %v649_v25 = vclz %v3543_v60  ;;  %v744_v0 = vsel %vm742_vm11, %v743_v13, %v4423_v7 }
 0x123   :  { %v367_v5 = vsel %vm365_vm9, %v3746_v20, %v366_v33  ;;  %v2045_v48 = vsel %vm2043_vm7, %v3746_v20, %v366_v33  ;;  %v668_v18 = vsel %vm583_vm5, %v667_v15, %v643_v54  ;;  %v745_v23 = vadd.s32 %v744_v0, %v740_v1 }
 0x124   :  { %v371_v58 = vsel %vm364_vm12, %v367_v5, %v370_v50  ;;  %v2049_v31 = vsel %vm2042_vm6, %v2045_v48, %v2048_v57  ;;  %v3544_v46 = vadd.s32 4294967294, %v649_v25  ;;  %v4464_v21 = vadd.f32 %v140_v59, %v3880_v24 }
 0x125   :  { %v372_v4 = vsel %vm361_vm4, nan, %v371_v58  ;;  %v2050_v41 = vsel %vm361_vm4, nan, %v2049_v31  ;;  %v3550_v43 = vadd.s32 4294967169, %v793_v52  ;;  %vm4468_vm13 = vcmp.le.f32.partialorder %v581_v49, 0.7853982 }
 0x126   :  { %1830 = vst [vmem:[#allocation2 + $0x8] sm:$0xff] %v372_v4  ;;  %3494 = vst [vmem:[#allocation2 + $0x88] sm:$0xff] %v2050_v41  ;;  %vm3545_vm14 = vcmp.lt.s32.totalorder %v3544_v46, 0  ;;  %v637_v10 = vadd.s32 %v4364_v44, %v4370_v56  ;;  %v746_v63 = vadd.s32 536870912, %v745_v23  ;;  %v670_v24 = vsel %vm4468_vm13, 0, %v668_v18 }
 0x127   :  { %v652_v7 = vsel %vm3545_vm14, 0, %v3544_v46  ;;  %v799_v62 = vadd.s32 1, %v3550_v43  ;;  %v796_v59 = vand.u32 8388607, %v789_v8  ;;  %v896_v49 = vand.u32 2139095040, %v4464_v21 }
 0x128   :  { %v653_v6 = vsub.s32 32, %v652_v7  ;;  %v657_v54 = vsub.s32 4294967266, %v652_v7  ;;  %v747_v11 = vshrl.u32 %v746_v63, 30  ;;  %v654_v19 = vshll.u32 %v4427_v55, %v652_v7 }
 0x129   :  { %vm800_vm15 = vcmp.gt.s32.totalorder %v799_v62, 0  ;;  %v674_v56 = vadd.s32 3, %v670_v24  ;;  %v797_v60 = vor.u32 8388608, %v796_v59  ;;  %v893_v51 = vand.u32 2147483647, %v4464_v21 }
 0x12a   :  { %v655_v20 = vshrl.u32 %v637_v10, %v653_v6  ;;  %v658_v53 = vadd.s32 127, %v657_v54  ;;  %v801_v44 = vsel %vm800_vm15, %v799_v62, 0  ;;  %v748_v12 = vshll.u32 %v747_v11, 30 }
 0x12b   :  { %v803_v61 = vand.u32 31, %v801_v44  ;;  %vm687_vm0 = vcmp.lt.s32.totalorder %v4245_v45, 0  ;;  %v771_v52 = vsub.s32 4, %v747_v11  ;;  %v897_v5 = vshrl.u32 %v896_v49, 23 }
 0x12c   :  { %v656_v15 = vor.u32 %v655_v20, %v654_v19  ;;  %v659_v33 = vshll.u32 %v658_v53, 23  ;;  %v4481_v13 = vsub.s32 %v745_v23, %v748_v12  ;;  %v4484_v55 = vand.u32 3, %v674_v56 }
 0x12d   :  { %v804_v50 = vsub.s32 32, %v803_v61  ;;  %v741_v48 = vadd.s32 %v4422_v9, %v4438_v42  ;;  %v4489_v58 = vand.u32 3, %v670_v24  ;;  %v4491_v4 = vshll.u32 %v797_v60, 8 }
 0x12e   :  { %v660_v57 = vor.u32 4788187, %v659_v33  ;;  %v751_v25 = vsub.s32 0, %v4481_v13  ;;  %v663_v1 = vcvt.s32.f32 %v656_v15  ;;  %v4495_v41 = vand.u32 8388607, %v893_v51 }
 0x12f   :  { %v4498_v0 = vshrl.u32 %v801_v44, 5  ;;  %v807_v18 = vshrl.u32 %v3824_v22, %v804_v50  ;;  %v810_v9 = vshrl.u32 %v3825_v26, %v804_v50  ;;  %v772_v23 = vsel %vm687_vm0, %v771_v52, %v747_v11 }
 0x130   :  { %v661_v31 = vand.u32 2147483647, %v660_v57  ;;  %v3547_v46 = vmin.u32 %v751_v25, %v4481_v13  ;;  %v806_v43 = vshll.u32 %v3823_v17, %v803_v61  ;;  %v3554_v10 = vadd.s32 4294967169, %v897_v5 }
 0x131   :  { %v805_v63 = vshrl.u32 %v3823_v17, %v804_v50  ;;  %v809_v62 = vshll.u32 %v3824_v22, %v803_v61  ;;  %v812_v6 = vshll.u32 %v3825_v26, %v803_v61  ;;  %v813_v24 = vshrl.u32 %v3826_v32, %v804_v50 }
 0x132   :  { %v664_v42 = vmul.f32 %v663_v1, %v661_v31  ;;  %v753_v7 = vclz %v3547_v46  ;;  %v815_v59 = vshll.u32 %v3826_v32, %v803_v61  ;;  %v816_v49 = vshrl.u32 %v3827_v40, %v804_v50 }
 0x133   :  { %v808_v20 = vor.u32 %v807_v18, %v806_v43  ;;  %v811_v11 = vor.u32 %v810_v9, %v809_v62  ;;  %v819_v53 = vshrl.u32 %v3828_v47, %v804_v50  ;;  %vm4516_vm1 = vcmp.le.f32.partialorder %v685_v3, 0.7853982 }
 0x134   :  { %v665_v54 = vxor.u32 2147483648, %v664_v42  ;;  %v3548_v19 = vadd.s32 4294967294, %v753_v7  ;;  %v814_v12 = vor.u32 %v813_v24, %v812_v6  ;;  %v817_v15 = vor.u32 %v816_v49, %v815_v59 }
 0x135   :  { %v818_v33 = vshll.u32 %v3827_v40, %v803_v61  ;;  %vm821_vm3 = vcmp.lt.s32.totalorder %v4498_v0, 1  ;;  %vm822_vm4 = vcmp.lt.s32.totalorder %v4498_v0, 2  ;;  %vm824_vm6 = vcmp.lt.s32.totalorder %v4498_v0, 4 }
 0x136   :  { %v666_v44 = vsel %vm583_vm5, %v665_v54, %v664_v42  ;;  %vm3549_vm2 = vcmp.lt.s32.totalorder %v3548_v19, 0  ;;  %vm823_vm5 = vcmp.lt.s32.totalorder %v4498_v0, 3  ;;  %v826_v5 = vsel %vm824_vm6, %v814_v12, 2102212464 }
 0x137   :  { %v669_v60 = vsel %vm4468_vm13, %v4230_v16, %v666_v44  ;;  %v756_v50 = vsel %vm3549_vm2, 0, %v3548_v19  ;;  %v820_v57 = vor.u32 %v819_v53, %v818_v33  ;;  %v829_v2 = vsel %vm821_vm3, %v808_v20, %v811_v11 }
 0x138   :  { %3749 = vcosq.f32 %v669_v60  ;;  %v757_v3 = vsub.s32 32, %v756_v50  ;;  %v761_v52 = vsub.s32 4294967266, %v756_v50  ;;  %v758_v61 = vshll.u32 %v4481_v13, %v756_v50 }
 0x139   :  { %3751 = vsinq.f32 %v669_v60  ;;  %v830_v25 = vsel %vm824_vm6, %v817_v15, 920167782  ;;  %v833_v18 = vsel %vm821_vm3, %v811_v11, %v814_v12  ;;  %v825_v9 = vsel %vm821_vm3, %v805_v63, %v808_v20 }
 0x13a   :  { %v759_v31 = vshrl.u32 %v741_v48, %v757_v3  ;;  %v762_v1 = vadd.s32 127, %v761_v52  ;;  %v831_v46 = vsel %vm823_vm5, %v814_v12, %v830_v25  ;;  %v834_v13 = vsel %vm824_vm6, %v820_v57, 1326507024 }
 0x13b   :  { %v832_v42 = vsel %vm822_vm4, %v829_v2, %v831_v46  ;;  %v903_v43 = vadd.s32 1, %v3554_v10  ;;  %v827_v48 = vsel %vm823_vm5, %v811_v11, %v826_v5  ;;  %v835_v6 = vsel %vm823_vm5, %v817_v15, %v834_v13 }
 0x13c   :  { %v760_v7 = vor.u32 %v759_v31, %v758_v61  ;;  %v763_v62 = vshll.u32 %v762_v1, 23  ;;  %vm676_vm7 = vcmp.lt.s32.totalorder %v4484_v55, 2  ;;  %vm2351_vm8 = vcmp.lt.s32.totalorder %v4489_v58, 2 }
 0x13d   :  { %v836_v63 = vsel %vm822_vm4, %v833_v18, %v835_v6  ;;  %v4548_v54 = vmul.u32.u64.low %v4491_v4, %v832_v42  ;;  %v4549_v24 = vmul.u32.u64.high %v4491_v4, %v832_v42, %v4548_v54  ;;  %vm904_vm9 = vcmp.gt.s32.totalorder %v903_v43, 0 }
 0x13e   :  { %vm673_vm10 = vweird.f32 %v4230_v16  ;;  %v764_v10 = vor.u32 4788187, %v763_v62  ;;  %v774_v59 = vsel %vm4516_vm1, 0, %v772_v23  ;;  %vm677_vm11 = vcmp.eq.s32.totalorder %v4484_v55, 0 }
 0x13f   :  { %v4556_v49 = vmul.u32.u64.low %v4491_v4, %v836_v63  ;;  %v4557_v19 = vmul.u32.u64.high %v4491_v4, %v836_v63, %v4556_v49  ;;  %vm680_vm12 = vcmp.eq.s32.totalorder %v4484_v55, 2  ;;  %v828_v20 = vsel %vm822_vm4, %v825_v9, %v827_v48 }
 0x140   :  { %v905_v11 = vsel %vm904_vm9, %v903_v43, 0  ;;  %v765_v53 = vand.u32 2147483647, %v764_v10  ;;  %v767_v44 = vcvt.s32.f32 %v760_v7  ;;  %vm2352_vm13 = vcmp.eq.s32.totalorder %v4489_v58, 0 }
 0x141   :  { %v907_v12 = vand.u32 31, %v905_v11  ;;  %v778_v33 = vadd.s32 3, %v774_v59  ;;  %vm2355_vm14 = vcmp.eq.s32.totalorder %v4489_v58, 2  ;;  %v847_v23 = vadd.s32 1, %v4549_v24 }
 0x142   :  { %v3750_v15 = vpop.eup %3749  ;;  %v901_v60 = vor.u32 8388608, %v4495_v41  ;;  %v768_v3 = vmul.f32 %v767_v44, %v765_v53  ;;  %v844_v0 = vmul.u32 %v4491_v4, %v828_v20  ;;  %vm846_vm15 = vc.u32 %v4557_v19, %v4548_v54 }
 0x143   :  { %v3752_v50 = vpop.eup %3751  ;;  %v681_v57 = vxor.u32 2147483648, %v3750_v15  ;;  %v4570_v61 = vand.u32 3, %v774_v59  ;;  %v848_v5 = vsel %vm846_vm15, %v847_v23, %v4549_v24  ;;  %v908_v2 = vsub.s32 32, %v907_v12  ;;  %v119_v23 = vpop.permute.xlu1 %118 }
 0x144   :  { %v678_v52 = vxor.u32 2147483648, %v3752_v50  ;;  %v769_v31 = vxor.u32 2147483648, %v768_v3  ;;  %v849_v41 = vadd.s32 %v848_v5, %v844_v0  ;;  %v4577_v18 = vand.u32 3, %v778_v33 }
 0x145   :  { %v682_v25 = vsel %vm680_vm12, %v681_v57, %v3752_v50  ;;  %v2357_v1 = vsel %vm2355_vm14, %v681_v57, %v3752_v50  ;;  %v911_v9 = vshrl.u32 %v3824_v22, %v908_v2  ;;  %v4595_v63 = vshrl.u32 %v905_v11, 5 }
 0x146   :  { %v679_v46 = vsel %vm677_vm11, %v3750_v15, %v678_v52  ;;  %v2354_v4 = vsel %vm2352_vm13, %v3750_v15, %v678_v52  ;;  %v770_v13 = vsel %vm687_vm0, %v769_v31, %v768_v3  ;;  %v850_v7 = vadd.s32 536870912, %v849_v41 }
 0x147   :  { %v683_v42 = vsel %vm676_vm7, %v679_v46, %v682_v25  ;;  %v2358_v43 = vsel %vm2351_vm8, %v2354_v4, %v2357_v1  ;;  %v773_v48 = vsel %vm4516_vm1, %v4245_v45, %v770_v13  ;;  %v910_v58 = vshll.u32 %v3823_v17, %v907_v12 }
 0x148   :  { %v684_v62 = vsel %vm673_vm10, nan, %v683_v42  ;;  %v2359_v6 = vsel %vm673_vm10, nan, %v2358_v43  ;;  %3753 = vcosq.f32 %v773_v48  ;;  %v4597_v55 = vshrl.u32 %v850_v7, 30 }
 0x149   :  { %1833 = vst [vmem:[#allocation2 + $0x20] sm:$0xff] %v684_v62  ;;  %3497 = vst [vmem:[#allocation2 + $0xa0] sm:$0xff] %v2359_v6  ;;  %v914_v24 = vshrl.u32 %v3825_v26, %v908_v2  ;;  %3755 = vsinq.f32 %v773_v48  ;;  %v913_v10 = vshll.u32 %v3824_v22, %v907_v12  ;;  %v916_v56 = vshll.u32 %v3825_v26, %v907_v12 }
 0x14a   :  { %v917_v59 = vshrl.u32 %v3826_v32, %v908_v2  ;;  %v852_v16 = vshll.u32 %v4597_v55, 30  ;;  %v912_v49 = vor.u32 %v911_v9, %v910_v58  ;;  %v919_v20 = vshll.u32 %v3826_v32, %v907_v12 }
 0x14b   :  { %v920_v11 = vshrl.u32 %v3827_v40, %v908_v2  ;;  %v915_v53 = vor.u32 %v914_v24, %v913_v10  ;;  %v922_v15 = vshll.u32 %v3827_v40, %v907_v12  ;;  %v923_v33 = vshrl.u32 %v3828_v47, %v908_v2 }
 0x14c   :  { %v918_v44 = vor.u32 %v917_v59, %v916_v56  ;;  %vm2458_vm0 = vcmp.eq.s32.totalorder %v4570_v61, 2  ;;  %v4610_v50 = vsub.s32 %v849_v41, %v852_v16  ;;  %vm781_vm1 = vcmp.eq.s32.totalorder %v4577_v18, 0 }
 0x14d   :  { %v921_v57 = vor.u32 %v920_v11, %v919_v20  ;;  %vm784_vm2 = vcmp.eq.s32.totalorder %v4577_v18, 2  ;;  %vm2455_vm3 = vcmp.eq.s32.totalorder %v4570_v61, 0  ;;  %v924_v3 = vor.u32 %v923_v33, %v922_v15 }
 0x14e   :  { %v941_v0 = vshll.u32 %v901_v60, 8  ;;  %vm780_vm4 = vcmp.lt.s32.totalorder %v4577_v18, 2  ;;  %vm2454_vm5 = vcmp.lt.s32.totalorder %v4570_v61, 2  ;;  %v855_v12 = vsub.s32 0, %v4610_v50 }
 0x14f   :  { %vm925_vm6 = vcmp.lt.s32.totalorder %v4595_v63, 1  ;;  %vm928_vm7 = vcmp.lt.s32.totalorder %v4595_v63, 4  ;;  %v141_v52 = vmul.f32 %v119_v23, %v3901_v38  ;;  %vm777_vm8 = vweird.f32 %v4245_v45 }
 0x150   :  { %vm927_vm9 = vcmp.lt.s32.totalorder %v4595_v63, 3  ;;  %v930_v5 = vsel %vm928_vm7, %v918_v44, 2102212464  ;;  %v933_v60 = vsel %vm925_vm6, %v912_v49, %v915_v53  ;;  %v934_v25 = vsel %vm928_vm7, %v921_v57, 920167782 }
 0x151   :  { %v3551_v31 = vmin.u32 %v855_v12, %v4610_v50  ;;  %v909_v1 = vshrl.u32 %v3823_v17, %v908_v2  ;;  %vm926_vm10 = vcmp.lt.s32.totalorder %v4595_v63, 2  ;;  %v935_v41 = vsel %vm927_vm9, %v918_v44, %v934_v25 }
 0x152   :  { %v936_v46 = vsel %vm926_vm10, %v933_v60, %v935_v41  ;;  %v937_v4 = vsel %vm925_vm6, %v915_v53, %v918_v44  ;;  %v938_v9 = vsel %vm928_vm7, %v924_v3, 1326507024  ;;  %v142_v42 = vmul.f32 %v119_v23, %v3903_v39  ;;  %v3754_v13 = vpop.eup %3753 }
 0x153   :  { %v857_v43 = vclz %v3551_v31  ;;  %v929_v7 = vsel %vm925_vm6, %v909_v1, %v912_v49  ;;  %v931_v2 = vsel %vm927_vm9, %v915_v53, %v930_v5  ;;  %v4640_v62 = vadd.f32 %v141_v52, %v3886_v29  ;;  %v3756_v48 = vpop.eup %3755 }
 0x154   :  { %v785_v6 = vxor.u32 2147483648, %v3754_v13  ;;  %v939_v58 = vsel %vm927_vm9, %v921_v57, %v938_v9  ;;  %v4644_v24 = vmul.u32.u64.low %v941_v0, %v936_v46  ;;  %v4645_v10 = vmul.u32.u64.high %v941_v0, %v936_v46, %v4644_v24 }
 0x155   :  { %v782_v56 = vxor.u32 2147483648, %v3756_v48  ;;  %v845_v59 = vadd.s32 %v4548_v54, %v4557_v19  ;;  %v3552_v16 = vadd.s32 4294967294, %v857_v43  ;;  %v940_v49 = vsel %vm926_vm10, %v937_v4, %v939_v58 }
 0x156   :  { %v786_v29 = vsel %vm784_vm2, %v785_v6, %v3756_v48  ;;  %v2460_v20 = vsel %vm2458_vm0, %v785_v6, %v3756_v48  ;;  %v4656_v11 = vmul.u32.u64.low %v941_v0, %v940_v49  ;;  %v4657_v53 = vmul.u32.u64.high %v941_v0, %v940_v49, %v4656_v11 }
 0x157   :  { %v783_v44 = vsel %vm781_vm1, %v3754_v13, %v782_v56  ;;  %v2457_v15 = vsel %vm2455_vm3, %v3754_v13, %v782_v56  ;;  %vm3553_vm11 = vcmp.lt.s32.totalorder %v3552_v16, 0  ;;  %v932_v54 = vsel %vm926_vm10, %v929_v7, %v931_v2 }
 0x158   :  { %v787_v19 = vsel %vm780_vm4, %v783_v44, %v786_v29  ;;  %v2461_v33 = vsel %vm2454_vm5, %v2457_v15, %v2460_v20  ;;  %v860_v23 = vsel %vm3553_vm11, 0, %v3552_v16  ;;  %v951_v57 = vadd.s32 1, %v4645_v10  ;;  %v4700_v29 = vpop.permute.xlu0 %122 }
 0x159   :  { %v788_v3 = vsel %vm777_vm8, nan, %v787_v19  ;;  %v2462_v12 = vsel %vm777_vm8, nan, %v2461_v33  ;;  %v861_v52 = vsub.s32 32, %v860_v23  ;;  %v875_v5 = vsub.s32 4, %v4597_v55 }
 0x15a   :  { %1834 = vst [vmem:[#allocation2 + $0x28] sm:$0xff] %v788_v3  ;;  %3498 = vst [vmem:[#allocation2 + $0xa8] sm:$0xff] %v2462_v12  ;;  %v865_v63 = vsub.s32 4294967266, %v860_v23  ;;  %v948_v18 = vmul.u32 %v941_v0, %v932_v54  ;;  %vm950_vm12 = vc.u32 %v4657_v53, %v4644_v24  ;;  %vm791_vm13 = vcmp.lt.s32.totalorder %v4409_v14, 0 }
 0x15b   :  { %v863_v61 = vshrl.u32 %v845_v59, %v861_v52  ;;  %v952_v60 = vsel %vm950_vm12, %v951_v57, %v4645_v10  ;;  %v4680_v25 = vadd.f32 %v142_v42, %v3888_v30  ;;  %v862_v45 = vshll.u32 %v4610_v50, %v860_v23 }
 0x15c   :  { %v866_v31 = vadd.s32 127, %v865_v63  ;;  %v953_v1 = vadd.s32 %v952_v60, %v948_v18  ;;  %v1000_v41 = vand.u32 2139095040, %v4640_v62  ;;  %v876_v0 = vsel %vm791_vm13, %v875_v5, %v4597_v55 }
 0x15d   :  { %v997_v46 = vand.u32 2147483647, %v4640_v62  ;;  %v864_v4 = vor.u32 %v863_v61, %v862_v45  ;;  %vm4690_vm14 = vcmp.le.f32.partialorder %v789_v8, 0.7853982  ;;  %v1104_v50 = vand.u32 2139095040, %v4680_v25 }
 0x15e   :  { %v867_v9 = vshll.u32 %v866_v31, 23  ;;  %v954_v13 = vadd.s32 536870912, %v953_v1  ;;  %v1001_v43 = vshrl.u32 %v1000_v41, 23  ;;  %v878_v7 = vsel %vm4690_vm14, 0, %v876_v0 }
 0x15f   :  { %v1004_v48 = vand.u32 8388607, %v997_v46  ;;  %v1101_v6 = vand.u32 2147483647, %v4680_v25  ;;  %v1105_v58 = vshrl.u32 %v1104_v50, 23  ;;  %v871_v56 = vcvt.s32.f32 %v864_v4 }
 0x160   :  { %v868_v42 = vor.u32 4788187, %v867_v9  ;;  %v955_v2 = vshrl.u32 %v954_v13, 30  ;;  %v3558_v55 = vadd.s32 4294967169, %v1001_v43  ;;  %v882_v16 = vadd.s32 3, %v878_v7 }
 0x161   :  { %v3562_v44 = vadd.s32 4294967169, %v1105_v58  ;;  %vm895_vm0 = vcmp.lt.s32.totalorder %v4464_v21, 0  ;;  %v1005_v15 = vor.u32 8388608, %v1004_v48  ;;  %v4708_v23 = vand.u32 8388607, %v1101_v6 }
 0x162   :  { %v869_v10 = vand.u32 2147483647, %v868_v42  ;;  %v956_v8 = vshll.u32 %v955_v2, 30  ;;  %v1007_v59 = vadd.s32 1, %v3558_v55  ;;  %v979_v49 = vsub.s32 4, %v955_v2 }
 0x163   :  { %v143_v57 = vmul.f32 %v4700_v29, %v3901_v38  ;;  %v4712_v3 = vand.u32 3, %v882_v16  ;;  %vm4716_vm1 = vcmp.le.f32.partialorder %v893_v51, 0.7853982  ;;  %v4720_v52 = vand.u32 3, %v878_v7 }
 0x164   :  { %v872_v20 = vmul.f32 %v871_v56, %v869_v10  ;;  %v4702_v11 = vsub.s32 %v953_v1, %v956_v8  ;;  %vm1008_vm15 = vcmp.gt.s32.totalorder %v1007_v59, 0  ;;  %v980_v61 = vsel %vm895_vm0, %v979_v49, %v955_v2 }
 0x165   :  { %v1009_v54 = vsel %vm1008_vm15, %v1007_v59, 0  ;;  %v4727_v60 = vadd.s32 1, %v3562_v44  ;;  %v949_v45 = vadd.s32 %v4644_v24, %v4657_v53  ;;  %v4734_v1 = vshll.u32 %v1005_v15, 8 }
 0x166   :  { %v873_v19 = vxor.u32 2147483648, %v872_v20  ;;  %v959_v33 = vsub.s32 0, %v4702_v11  ;;  %v1011_v5 = vand.u32 31, %v1009_v54  ;;  %v1109_v0 = vor.u32 8388608, %v4708_v23 }
 0x167   :  { %v4738_v4 = vadd.f32 %v143_v57, %v3882_v27  ;;  %v4742_v9 = vsel %vm4716_vm1, 0, %v980_v61  ;;  %v1010_v13 = vshrl.u32 %v1009_v54, 5  ;;  %vm1112_vm2 = vcmp.gt.s32.totalorder %v4727_v60, 0 }
 0x168   :  { %v874_v63 = vsel %vm791_vm13, %v873_v19, %v872_v20  ;;  %v3555_v18 = vmin.u32 %v959_v33, %v4702_v11  ;;  %v1012_v31 = vsub.s32 32, %v1011_v5  ;;  %v1014_v43 = vshll.u32 %v3823_v17, %v1011_v5 }
 0x169   :  { %v877_v51 = vsel %vm4690_vm14, %v4409_v14, %v874_v63  ;;  %v1017_v53 = vshll.u32 %v3824_v22, %v1011_v5  ;;  %v1020_v27 = vshll.u32 %v3825_v26, %v1011_v5  ;;  %v1023_v7 = vshll.u32 %v3826_v32, %v1011_v5 }
 0x16a   :  { %3757 = vcosq.f32 %v877_v51  ;;  %v961_v41 = vclz %v3555_v18  ;;  %v1015_v24 = vshrl.u32 %v3824_v22, %v1012_v31  ;;  %v1018_v50 = vshrl.u32 %v3825_v26, %v1012_v31 }
 0x16b   :  { %3759 = vsinq.f32 %v877_v51  ;;  %v1021_v42 = vshrl.u32 %v3826_v32, %v1012_v31  ;;  %v1024_v2 = vshrl.u32 %v3827_v40, %v1012_v31  ;;  %vm888_vm3 = vcmp.eq.s32.totalorder %v4712_v3, 2 }
 0x16c   :  { %v3556_v30 = vadd.s32 4294967294, %v961_v41  ;;  %vm2561_vm5 = vcmp.eq.s32.totalorder %v4720_v52, 2  ;;  %v1016_v55 = vor.u32 %v1015_v24, %v1014_v43  ;;  %v1019_v48 = vor.u32 %v1018_v50, %v1017_v53 }
 0x16d   :  { %v1026_v58 = vshll.u32 %v3827_v40, %v1011_v5  ;;  %vm885_vm6 = vcmp.eq.s32.totalorder %v4712_v3, 0  ;;  %vm2558_vm7 = vcmp.eq.s32.totalorder %v4720_v52, 0  ;;  %v1022_v56 = vor.u32 %v1021_v42, %v1020_v27 }
 0x16e   :  { %vm3557_vm4 = vcmp.lt.s32.totalorder %v3556_v30, 0  ;;  %v1025_v8 = vor.u32 %v1024_v2, %v1023_v7  ;;  %v1027_v59 = vshrl.u32 %v3828_v47, %v1012_v31  ;;  %vm884_vm8 = vcmp.lt.s32.totalorder %v4712_v3, 2 }
 0x16f   :  { %v964_v10 = vsel %vm3557_vm4, 0, %v3556_v30  ;;  %vm2557_vm9 = vcmp.lt.s32.totalorder %v4720_v52, 2  ;;  %v1013_v44 = vshrl.u32 %v3823_v17, %v1012_v31  ;;  %vm881_vm10 = vweird.f32 %v4409_v14 }
 0x170   :  { %v965_v16 = vsub.s32 32, %v964_v10  ;;  %v966_v49 = vshll.u32 %v4702_v11, %v964_v10  ;;  %v969_v20 = vsub.s32 4294967266, %v964_v10  ;;  %v1028_v15 = vor.u32 %v1027_v59, %v1026_v58 }
 0x171   :  { %vm1029_vm11 = vcmp.lt.s32.totalorder %v1010_v13, 1  ;;  %vm1031_vm12 = vcmp.lt.s32.totalorder %v1010_v13, 3  ;;  %vm1032_vm13 = vcmp.lt.s32.totalorder %v1010_v13, 4  ;;  %vm1030_vm14 = vcmp.lt.s32.totalorder %v1010_v13, 2 }
 0x172   :  { %v967_v54 = vshrl.u32 %v949_v45, %v965_v16  ;;  %v970_v19 = vadd.s32 127, %v969_v20  ;;  %v1033_v33 = vsel %vm1029_vm11, %v1013_v44, %v1016_v55  ;;  %v1034_v23 = vsel %vm1032_vm13, %v1022_v56, 2102212464 }
 0x173   :  { %v1035_v57 = vsel %vm1031_vm12, %v1019_v48, %v1034_v23  ;;  %v1037_v11 = vsel %vm1029_vm11, %v1016_v55, %v1019_v48  ;;  %v1038_v5 = vsel %vm1032_vm13, %v1025_v8, 920167782  ;;  %v1041_v31 = vsel %vm1029_vm11, %v1019_v48, %v1022_v56 }
 0x174   :  { %v3758_v63 = vpop.eup %3757  ;;  %v968_v18 = vor.u32 %v967_v54, %v966_v49  ;;  %v971_v61 = vshll.u32 %v970_v19, 23  ;;  %v1039_v51 = vsel %vm1031_vm12, %v1022_v56, %v1038_v5  ;;  %v1036_v45 = vsel %vm1030_vm14, %v1033_v33, %v1035_v57 }
 0x175   :  { %v3760_v41 = vpop.eup %3759  ;;  %v889_v43 = vxor.u32 2147483648, %v3758_v63  ;;  %v1042_v30 = vsel %vm1032_vm13, %v1028_v15, 1326507024  ;;  %v4770_v24 = vshll.u32 %v1109_v0, 8  ;;  %v1040_v27 = vsel %vm1030_vm14, %v1037_v11, %v1039_v51 }
 0x176   :  { %v886_v53 = vxor.u32 2147483648, %v3760_v41  ;;  %v972_v50 = vor.u32 4788187, %v971_v61  ;;  %v1043_v42 = vsel %vm1031_vm12, %v1025_v8, %v1042_v30  ;;  %v1113_v48 = vsel %vm1112_vm2, %v4727_v60, 0 }
 0x177   :  { %v890_v7 = vsel %vm888_vm3, %v889_v43, %v3760_v41  ;;  %v2563_v2 = vsel %vm2561_vm5, %v889_v43, %v3760_v41  ;;  %v1044_v55 = vsel %vm1030_vm14, %v1041_v31, %v1043_v42  ;;  %v975_v10 = vcvt.s32.f32 %v968_v18 }
 0x178   :  { %v887_v0 = vsel %vm885_vm6, %v3758_v63, %v886_v53  ;;  %v973_v58 = vand.u32 2147483647, %v972_v50  ;;  %v2560_v56 = vsel %vm2558_vm7, %v3758_v63, %v886_v53  ;;  %v1115_v44 = vand.u32 31, %v1113_v48 }
 0x179   :  { %v891_v8 = vsel %vm884_vm8, %v887_v0, %v890_v7  ;;  %v2564_v59 = vsel %vm2557_vm9, %v2560_v56, %v2563_v2  ;;  %v4791_v13 = vmul.u32.u64.low %v4734_v1, %v1044_v55  ;;  %v4792_v16 = vmul.u32.u64.high %v4734_v1, %v1044_v55, %v4791_v13 }
 0x17a   :  { %v892_v60 = vsel %vm881_vm10, nan, %v891_v8  ;;  %v976_v49 = vmul.f32 %v975_v10, %v973_v58  ;;  %v2565_v20 = vsel %vm881_vm10, nan, %v2564_v59  ;;  %v986_v15 = vadd.s32 3, %v4742_v9 }
 0x17b   :  { %1835 = vst [vmem:[#allocation2 + $0x30] sm:$0xff] %v892_v60  ;;  %v4800_v3 = vand.u32 3, %v4742_v9  ;;  %3499 = vst [vmem:[#allocation2 + $0xb0] sm:$0xff] %v2565_v20  ;;  %v4803_v52 = vmul.u32.u64.low %v4734_v1, %v1040_v27  ;;  %v4804_v54 = vmul.u32.u64.high %v4734_v1, %v1040_v27, %v4803_v52  ;;  %v1052_v33 = vmul.u32 %v4734_v1, %v1036_v45 }
 0x17c   :  { %v977_v19 = vxor.u32 2147483648, %v976_v49  ;;  %v1114_v23 = vshrl.u32 %v1113_v48, 5  ;;  %v1116_v57 = vsub.s32 32, %v1115_v44  ;;  %v1118_v14 = vshll.u32 %v3823_v17, %v1115_v44 }
 0x17d   :  { %vm1054_vm15 = vc.u32 %v4792_v16, %v4803_v52  ;;  %v1121_v11 = vshll.u32 %v3824_v22, %v1115_v44  ;;  %v1124_v9 = vshll.u32 %v3825_v26, %v1115_v44  ;;  %v1127_v1 = vshll.u32 %v3826_v32, %v1115_v44 }
 0x17e   :  { %v978_v5 = vsel %vm895_vm0, %v977_v19, %v976_v49  ;;  %v1119_v63 = vshrl.u32 %v3824_v22, %v1116_v57  ;;  %v1122_v18 = vshrl.u32 %v3825_v26, %v1116_v57  ;;  %v1055_v51 = vadd.s32 1, %v4804_v54 }
 0x17f   :  { %v981_v61 = vsel %vm4716_vm1, %v4464_v21, %v978_v5  ;;  %v1125_v31 = vshrl.u32 %v3826_v32, %v1116_v57  ;;  %v1128_v41 = vshrl.u32 %v3827_v40, %v1116_v57  ;;  %vm1133_vm0 = vcmp.lt.s32.totalorder %v1114_v23, 1 }
 0x180   :  { %3761 = vcosq.f32 %v981_v61  ;;  %v1120_v43 = vor.u32 %v1119_v63, %v1118_v14  ;;  %v1123_v45 = vor.u32 %v1122_v18, %v1121_v11  ;;  %v1056_v30 = vsel %vm1054_vm15, %v1055_v51, %v4804_v54 }
 0x181   :  { %3763 = vsinq.f32 %v981_v61  ;;  %v1126_v53 = vor.u32 %v1125_v31, %v1124_v9  ;;  %v1129_v50 = vor.u32 %v1128_v41, %v1127_v1  ;;  %v1057_v12 = vadd.s32 %v1056_v30, %v1052_v33 }
 0x182   :  { %v1130_v27 = vshll.u32 %v3827_v40, %v1115_v44  ;;  %v1131_v42 = vshrl.u32 %v3828_v47, %v1116_v57  ;;  %vm1136_vm1 = vcmp.lt.s32.totalorder %v1114_v23, 4  ;;  %vm1134_vm2 = vcmp.lt.s32.totalorder %v1114_v23, 2 }
 0x183   :  { %vm1135_vm3 = vcmp.lt.s32.totalorder %v1114_v23, 3  ;;  %v1141_v7 = vsel %vm1133_vm0, %v1120_v43, %v1123_v45  ;;  %v1142_v2 = vsel %vm1136_vm1, %v1129_v50, 920167782  ;;  %v1058_v55 = vadd.s32 536870912, %v1057_v12 }
 0x184   :  { %v1132_v48 = vor.u32 %v1131_v42, %v1130_v27  ;;  %v1138_v0 = vsel %vm1136_vm1, %v1126_v53, 2102212464  ;;  %v1143_v58 = vsel %vm1135_vm3, %v1126_v53, %v1142_v2  ;;  %v987_v10 = vand.u32 3, %v986_v15 }
 0x185   :  { %v1117_v56 = vshrl.u32 %v3823_v17, %v1116_v57  ;;  %v1144_v8 = vsel %vm1134_vm2, %v1141_v7, %v1143_v58  ;;  %v1145_v59 = vsel %vm1133_vm0, %v1123_v45, %v1126_v53  ;;  %v1059_v13 = vshrl.u32 %v1058_v55, 30 }
 0x186   :  { %v1146_v60 = vsel %vm1136_vm1, %v1132_v48, 1326507024  ;;  %v4836_v49 = vmul.u32.u64.low %v4770_v24, %v1144_v8  ;;  %v4837_v20 = vmul.u32.u64.high %v4770_v24, %v1144_v8, %v4836_v49  ;;  %v1139_v54 = vsel %vm1135_vm3, %v1123_v45, %v1138_v0 }
 0x187   :  { %v1137_v44 = vsel %vm1133_vm0, %v1117_v56, %v1120_v43  ;;  %v1147_v19 = vsel %vm1135_vm3, %v1129_v50, %v1146_v60  ;;  %v1208_v15 = vand.u32 2139095040, %v4738_v4  ;;  %vm985_vm4 = vweird.f32 %v4464_v21 }
 0x188   :  { %v1060_v33 = vshll.u32 %v1059_v13, 30  ;;  %v1148_v57 = vsel %vm1134_vm2, %v1145_v59, %v1147_v19  ;;  %v144_v14 = vmul.f32 %v4700_v29, %v3903_v39  ;;  %vm2660_vm5 = vcmp.lt.s32.totalorder %v4800_v3, 2 }
 0x189   :  { %v4850_v11 = vmul.u32.u64.low %v4770_v24, %v1148_v57  ;;  %v4851_v9 = vmul.u32.u64.high %v4770_v24, %v1148_v57, %v4850_v11  ;;  %v1205_v5 = vand.u32 2147483647, %v4738_v4  ;;  %vm2661_vm6 = vcmp.eq.s32.totalorder %v4800_v3, 0 }
 0x18a   :  { %v3762_v63 = vpop.eup %3761  ;;  %v1061_v18 = vsub.s32 %v1057_v12, %v1060_v33  ;;  %v1140_v1 = vsel %vm1134_vm2, %v1137_v44, %v1139_v54  ;;  %v1209_v61 = vshrl.u32 %v1208_v15, 23  ;;  %vm988_vm7 = vcmp.lt.s32.totalorder %v987_v10, 2 }
 0x18b   :  { %v3764_v51 = vpop.eup %3763  ;;  %v993_v31 = vxor.u32 2147483648, %v3762_v63  ;;  %vm2664_vm8 = vcmp.eq.s32.totalorder %v4800_v3, 2  ;;  %v1159_v29 = vadd.s32 1, %v4837_v20  ;;  %vm989_vm9 = vcmp.eq.s32.totalorder %v987_v10, 0 }
 0x18c   :  { %v990_v41 = vxor.u32 2147483648, %v3764_v51  ;;  %vm992_vm10 = vcmp.eq.s32.totalorder %v987_v10, 2  ;;  %v1063_v43 = vsub.s32 0, %v1061_v18  ;;  %v1156_v53 = vmul.u32 %v4770_v24, %v1140_v1 }
 0x18d   :  { %v994_v45 = vsel %vm992_vm10, %v993_v31, %v3764_v51  ;;  %v2666_v30 = vsel %vm2664_vm8, %v993_v31, %v3764_v51  ;;  %vm1158_vm11 = vc.u32 %v4851_v9, %v4836_v49  ;;  %v3566_v27 = vadd.s32 4294967169, %v1209_v61 }
 0x18e   :  { %v991_v23 = vsel %vm989_vm9, %v3762_v63, %v990_v41  ;;  %v2663_v50 = vsel %vm2661_vm6, %v3762_v63, %v990_v41  ;;  %v3559_v12 = vmin.u32 %v1063_v43, %v1061_v18  ;;  %v1083_v2 = vsub.s32 4, %v1059_v13 }
 0x18f   :  { %v995_v42 = vsel %vm988_vm7, %v991_v23, %v994_v45  ;;  %v2667_v7 = vsel %vm2660_vm5, %v2663_v50, %v2666_v30  ;;  %v1160_v55 = vsel %vm1158_vm11, %v1159_v29, %v4837_v20  ;;  %v4872_v56 = vadd.f32 %v144_v14, %v3884_v28 }
 0x190   :  { %v996_v24 = vsel %vm985_vm4, nan, %v995_v42  ;;  %v2668_v48 = vsel %vm985_vm4, nan, %v2667_v7  ;;  %v1065_v0 = vclz %v3559_v12  ;;  %v1161_v58 = vadd.s32 %v1160_v55, %v1156_v53 }
 0x191   :  { %1836 = vst [vmem:[#allocation2 + $0x38] sm:$0xff] %v996_v24  ;;  %3500 = vst [vmem:[#allocation2 + $0xb8] sm:$0xff] %v2668_v48  ;;  %vm999_vm12 = vcmp.lt.s32.totalorder %v4640_v62, 0  ;;  %v1215_v10 = vadd.s32 1, %v3566_v27  ;;  %v1212_v60 = vand.u32 8388607, %v1205_v5  ;;  %v1157_v50 = vadd.s32 %v4836_v49, %v4851_v9 }
 0x192   :  { %v3560_v3 = vadd.s32 4294967294, %v1065_v0  ;;  %v1084_v8 = vsel %vm999_vm12, %v1083_v2, %v1059_v13  ;;  %v1162_v59 = vadd.s32 536870912, %v1161_v58  ;;  %vm4881_vm13 = vcmp.le.f32.partialorder %v997_v46, 0.7853982 }
 0x193   :  { %vm1216_vm15 = vcmp.gt.s32.totalorder %v1215_v10, 0  ;;  %v1312_v54 = vand.u32 2139095040, %v4872_v56  ;;  %v1053_v13 = vadd.s32 %v4803_v52, %v4792_v16  ;;  %v1086_v33 = vsel %vm4881_vm13, 0, %v1084_v8 }
 0x194   :  { %vm3561_vm14 = vcmp.lt.s32.totalorder %v3560_v3, 0  ;;  %v1163_v20 = vshrl.u32 %v1162_v59, 30  ;;  %v1217_v44 = vsel %vm1216_vm15, %v1215_v10, 0  ;;  %v1213_v46 = vor.u32 8388608, %v1212_v60 }
 0x195   :  { %v1068_v28 = vsel %vm3561_vm14, 0, %v3560_v3  ;;  %v1219_v14 = vand.u32 31, %v1217_v44  ;;  %v1090_v51 = vadd.s32 3, %v1086_v33  ;;  %v1313_v41 = vshrl.u32 %v1312_v54, 23 }
 0x196   :  { %v1069_v19 = vsub.s32 32, %v1068_v28  ;;  %v1073_v15 = vsub.s32 4294967266, %v1068_v28  ;;  %v1164_v57 = vshll.u32 %v1163_v20, 30  ;;  %v1070_v11 = vshll.u32 %v1061_v18, %v1068_v28 }
 0x197   :  { %v1187_v61 = vsub.s32 4, %v1163_v20  ;;  %v1220_v29 = vsub.s32 32, %v1219_v14  ;;  %vm4894_vm0 = vcmp.le.f32.partialorder %v1101_v6, 0.7853982  ;;  %vm1103_vm1 = vcmp.lt.s32.totalorder %v4680_v25, 0 }
 0x198   :  { %v1071_v63 = vshrl.u32 %v1053_v13, %v1069_v19  ;;  %v1074_v1 = vadd.s32 127, %v1073_v15  ;;  %v4890_v31 = vsub.s32 %v1161_v58, %v1164_v57  ;;  %v4900_v18 = vand.u32 3, %v1086_v33 }
 0x199   :  { %v4902_v30 = vshrl.u32 %v1217_v44, 5  ;;  %v1309_v53 = vand.u32 2147483647, %v4872_v56  ;;  %v1188_v6 = vsel %vm1103_vm1, %v1187_v61, %v1163_v20  ;;  %v1223_v12 = vshrl.u32 %v3824_v22, %v1220_v29 }
 0x19a   :  { %v1072_v43 = vor.u32 %v1071_v63, %v1070_v11  ;;  %v1075_v45 = vshll.u32 %v1074_v1, 23  ;;  %v1167_v52 = vsub.s32 0, %v4890_v31  ;;  %v4910_v27 = vand.u32 3, %v1090_v51 }
 0x19b   :  { %v4913_v7 = vshll.u32 %v1213_v46, 8  ;;  %v3570_v2 = vadd.s32 4294967169, %v1313_v41  ;;  %v1222_v48 = vshll.u32 %v3823_v17, %v1219_v14  ;;  %v1226_v0 = vshrl.u32 %v3825_v26, %v1220_v29 }
 0x19c   :  { %v1076_v23 = vor.u32 4788187, %v1075_v45  ;;  %v3563_v42 = vmin.u32 %v1167_v52, %v4890_v31  ;;  %v1079_v24 = vcvt.s32.f32 %v1072_v43  ;;  %v4919_v49 = vsel %vm4894_vm0, 0, %v1188_v6 }
 0x19d   :  { %v1225_v9 = vshll.u32 %v3824_v22, %v1219_v14  ;;  %vm1237_vm2 = vcmp.lt.s32.totalorder %v4902_v30, 1  ;;  %v1224_v10 = vor.u32 %v1223_v12, %v1222_v48  ;;  %v1228_v8 = vshll.u32 %v3825_v26, %v1219_v14 }
 0x19e   :  { %v1077_v55 = vand.u32 2147483647, %v1076_v23  ;;  %v1169_v58 = vclz %v3563_v42  ;;  %v1229_v59 = vshrl.u32 %v3826_v32, %v1220_v29  ;;  %vm1238_vm3 = vcmp.lt.s32.totalorder %v4902_v30, 2 }
 0x19f   :  { %v1231_v28 = vshll.u32 %v3826_v32, %v1219_v14  ;;  %v1232_v20 = vshrl.u32 %v3827_v40, %v1220_v29  ;;  %v1235_v44 = vshrl.u32 %v3828_v47, %v1220_v29  ;;  %v1227_v13 = vor.u32 %v1226_v0, %v1225_v9 }
 0x1a0   :  { %v1080_v3 = vmul.f32 %v1079_v24, %v1077_v55  ;;  %v3564_v60 = vadd.s32 4294967294, %v1169_v58  ;;  %v1230_v19 = vor.u32 %v1229_v59, %v1228_v8  ;;  %v1234_v15 = vshll.u32 %v3827_v40, %v1219_v14 }
 0x1a1   :  { %v1221_v33 = vshrl.u32 %v3823_v17, %v1220_v29  ;;  %v1233_v57 = vor.u32 %v1232_v20, %v1231_v28  ;;  %vm1239_vm5 = vcmp.lt.s32.totalorder %v4902_v30, 3  ;;  %vm1240_vm6 = vcmp.lt.s32.totalorder %v4902_v30, 4 }
 0x1a2   :  { %v1081_v54 = vxor.u32 2147483648, %v1080_v3  ;;  %vm3565_vm4 = vcmp.lt.s32.totalorder %v3564_v60, 0  ;;  %v1236_v63 = vor.u32 %v1235_v44, %v1234_v15  ;;  %v1242_v14 = vsel %vm1240_vm6, %v1230_v19, 2102212464 }
 0x1a3   :  { %v1172_v11 = vsel %vm3565_vm4, 0, %v3564_v60  ;;  %v1245_v41 = vsel %vm1237_vm2, %v1224_v10, %v1227_v13  ;;  %v1246_v43 = vsel %vm1240_vm6, %v1233_v57, 920167782  ;;  %v1249_v21 = vsel %vm1237_vm2, %v1227_v13, %v1230_v19 }
 0x1a4   :  { %v1082_v46 = vsel %vm999_vm12, %v1081_v54, %v1080_v3  ;;  %v1173_v61 = vsub.s32 32, %v1172_v11  ;;  %v1177_v51 = vsub.s32 4294967266, %v1172_v11  ;;  %v1174_v29 = vshll.u32 %v4890_v31, %v1172_v11 }
 0x1a5   :  { %v1085_v1 = vsel %vm4881_vm13, %v4640_v62, %v1082_v46  ;;  %v1241_v23 = vsel %vm1237_vm2, %v1221_v33, %v1224_v10  ;;  %v1243_v6 = vsel %vm1239_vm5, %v1227_v13, %v1242_v14  ;;  %v1247_v31 = vsel %vm1239_vm5, %v1230_v19, %v1246_v43 }
 0x1a6   :  { %3765 = vcosq.f32 %v1085_v1  ;;  %v1175_v45 = vshrl.u32 %v1157_v50, %v1173_v61  ;;  %v1178_v52 = vadd.s32 127, %v1177_v51  ;;  %v1250_v12 = vsel %vm1240_vm6, %v1236_v63, 1326507024 }
 0x1a7   :  { %3767 = vsinq.f32 %v1085_v1  ;;  %v1248_v50 = vsel %vm1238_vm3, %v1245_v41, %v1247_v31  ;;  %v1251_v24 = vsel %vm1239_vm5, %v1233_v57, %v1250_v12  ;;  %v1319_v9 = vadd.s32 1, %v3570_v2 }
 0x1a8   :  { %v1176_v42 = vor.u32 %v1175_v45, %v1174_v29  ;;  %v1179_v55 = vshll.u32 %v1178_v52, 23  ;;  %v1252_v48 = vsel %vm1238_vm3, %v1249_v21, %v1251_v24  ;;  %vm1093_vm7 = vcmp.eq.s32.totalorder %v4910_v27, 0 }
 0x1a9   :  { %v4962_v0 = vmul.u32.u64.low %v4913_v7, %v1248_v50  ;;  %v4963_v58 = vmul.u32.u64.high %v4913_v7, %v1248_v50, %v4962_v0  ;;  %v4968_v10 = vmul.u32.u64.low %v4913_v7, %v1252_v48  ;;  %v4969_v8 = vmul.u32.u64.high %v4913_v7, %v1252_v48, %v4968_v10 }
 0x1aa   :  { %v1180_v3 = vor.u32 4788187, %v1179_v55  ;;  %vm1092_vm8 = vcmp.lt.s32.totalorder %v4910_v27, 2  ;;  %v1194_v59 = vadd.s32 3, %v4919_v49  ;;  %vm2763_vm9 = vcmp.lt.s32.totalorder %v4900_v18, 2 }
 0x1ab   :  { %v1244_v60 = vsel %vm1238_vm3, %v1241_v23, %v1243_v6  ;;  %v4978_v28 = vand.u32 8388607, %v1309_v53  ;;  %vm1320_vm10 = vcmp.gt.s32.totalorder %v1319_v9, 0  ;;  %vm1089_vm11 = vweird.f32 %v4640_v62  ;;  %v127_v62 = vpop.permute.xlu1 %126 }
 0x1ac   :  { %vm1096_vm12 = vcmp.eq.s32.totalorder %v4910_v27, 2  ;;  %v1181_v2 = vand.u32 2147483647, %v1180_v3  ;;  %v1183_v20 = vcvt.s32.f32 %v1176_v42  ;;  %v1321_v44 = vsel %vm1320_vm10, %v1319_v9, 0 }
 0x1ad   :  { %vm2764_vm13 = vcmp.eq.s32.totalorder %v4900_v18, 0  ;;  %vm2767_vm14 = vcmp.eq.s32.totalorder %v4900_v18, 2  ;;  %v1263_v54 = vadd.s32 1, %v4963_v58  ;;  %v1323_v30 = vand.u32 31, %v1321_v44 }
 0x1ae   :  { %v1184_v13 = vmul.f32 %v1183_v20, %v1181_v2  ;;  %v4986_v19 = vand.u32 3, %v4919_v49  ;;  %v1260_v15 = vmul.u32 %v4913_v7, %v1244_v60  ;;  %vm1262_vm15 = vc.u32 %v4969_v8, %v4962_v0 }
 0x1af   :  { %v4991_v57 = vand.u32 3, %v1194_v59  ;;  %v1264_v46 = vsel %vm1262_vm15, %v1263_v54, %v4963_v58  ;;  %v1317_v11 = vor.u32 8388608, %v4978_v28  ;;  %v1324_v63 = vsub.s32 32, %v1323_v30 }
 0x1b0   :  { %v3766_v33 = vpop.eup %3765  ;;  %v1185_v51 = vxor.u32 2147483648, %v1184_v13  ;;  %v1265_v14 = vadd.s32 %v1264_v46, %v1260_v15  ;;  %v4995_v29 = vshrl.u32 %v1321_v44, 5  ;;  %v1326_v7 = vshll.u32 %v3823_v17, %v1323_v30 }
 0x1b1   :  { %v3768_v1 = vpop.eup %3767  ;;  %v1097_v61 = vxor.u32 2147483648, %v3766_v33  ;;  %v1327_v41 = vshrl.u32 %v3824_v22, %v1324_v63  ;;  %v1330_v43 = vshrl.u32 %v3825_v26, %v1324_v63  ;;  %v1329_v42 = vshll.u32 %v3824_v22, %v1323_v30 }
 0x1b2   :  { %v1094_v49 = vxor.u32 2147483648, %v3768_v1  ;;  %v1186_v52 = vsel %vm1103_vm1, %v1185_v51, %v1184_v13  ;;  %v1266_v23 = vadd.s32 536870912, %v1265_v14  ;;  %v1332_v58 = vshll.u32 %v3825_v26, %v1323_v30 }
 0x1b3   :  { %v1098_v45 = vsel %vm1096_vm12, %v1097_v61, %v3768_v1  ;;  %v2769_v21 = vsel %vm2767_vm14, %v1097_v61, %v3768_v1  ;;  %v1189_v31 = vsel %vm4894_vm0, %v4680_v25, %v1186_v52  ;;  %v1328_v9 = vor.u32 %v1327_v41, %v1326_v7 }
 0x1b4   :  { %v1095_v6 = vsel %vm1093_vm7, %v3766_v33, %v1094_v49  ;;  %v2766_v12 = vsel %vm2764_vm13, %v3766_v33, %v1094_v49  ;;  %3769 = vcosq.f32 %v1189_v31  ;;  %v5018_v24 = vshrl.u32 %v1266_v23, 30 }
 0x1b5   :  { %v1099_v55 = vsel %vm1092_vm8, %v1095_v6, %v1098_v45  ;;  %v2770_v50 = vsel %vm2763_vm9, %v2766_v12, %v2769_v21  ;;  %3771 = vsinq.f32 %v1189_v31  ;;  %v1331_v3 = vor.u32 %v1330_v43, %v1329_v42 }
 0x1b6   :  { %v1100_v48 = vsel %vm1089_vm11, nan, %v1099_v55  ;;  %v2771_v16 = vsel %vm1089_vm11, nan, %v2770_v50  ;;  %v1268_v27 = vshll.u32 %v5018_v24, 30  ;;  %v1333_v18 = vshrl.u32 %v3826_v32, %v1324_v63 }
 0x1b7   :  { %1837 = vst [vmem:[#allocation2 + $0x40] sm:$0xff] %v1100_v48  ;;  %3501 = vst [vmem:[#allocation2 + $0xc0] sm:$0xff] %v2771_v16  ;;  %v1335_v10 = vshll.u32 %v3826_v32, %v1323_v30  ;;  %v1336_v59 = vshrl.u32 %v3827_v40, %v1324_v63  ;;  %v1338_v60 = vshll.u32 %v3827_v40, %v1323_v30  ;;  %vm2870_vm0 = vcmp.eq.s32.totalorder %v4986_v19, 2 }
 0x1b8   :  { %v1339_v28 = vshrl.u32 %v3828_v47, %v1324_v63  ;;  %v5032_v2 = vsub.s32 %v1265_v14, %v1268_v27  ;;  %v1334_v20 = vor.u32 %v1333_v18, %v1332_v58  ;;  %vm1197_vm1 = vcmp.eq.s32.totalorder %v4991_v57, 0 }
 0x1b9   :  { %vm1200_vm2 = vcmp.eq.s32.totalorder %v4991_v57, 2  ;;  %vm2867_vm3 = vcmp.eq.s32.totalorder %v4986_v19, 0  ;;  %v1337_v44 = vor.u32 %v1336_v59, %v1335_v10  ;;  %v1357_v13 = vshll.u32 %v1317_v11, 8 }
 0x1ba   :  { %v1340_v54 = vor.u32 %v1339_v28, %v1338_v60  ;;  %vm1196_vm4 = vcmp.lt.s32.totalorder %v4991_v57, 2  ;;  %vm2866_vm5 = vcmp.lt.s32.totalorder %v4986_v19, 2  ;;  %v1271_v30 = vsub.s32 0, %v5032_v2 }
 0x1bb   :  { %vm1341_vm6 = vcmp.lt.s32.totalorder %v4995_v29, 1  ;;  %vm1344_vm7 = vcmp.lt.s32.totalorder %v4995_v29, 4  ;;  %v145_v15 = vmul.f32 %v127_v62, %v3901_v38  ;;  %vm1193_vm8 = vweird.f32 %v4680_v25 }
 0x1bc   :  { %vm1343_vm9 = vcmp.lt.s32.totalorder %v4995_v29, 3  ;;  %v1346_v33 = vsel %vm1344_vm7, %v1334_v20, 2102212464  ;;  %v1349_v46 = vsel %vm1341_vm6, %v1328_v9, %v1331_v3  ;;  %v1350_v11 = vsel %vm1344_vm7, %v1337_v44, 920167782 }
 0x1bd   :  { %v3567_v1 = vmin.u32 %v1271_v30, %v5032_v2  ;;  %v1325_v61 = vshrl.u32 %v3823_v17, %v1324_v63  ;;  %vm1342_vm10 = vcmp.lt.s32.totalorder %v4995_v29, 2  ;;  %v1351_v51 = vsel %vm1343_vm9, %v1334_v20, %v1350_v11 }
 0x1be   :  { %v1352_v14 = vsel %vm1342_vm10, %v1349_v46, %v1351_v51  ;;  %v1353_v49 = vsel %vm1341_vm6, %v1331_v3, %v1334_v20  ;;  %v1354_v7 = vsel %vm1344_vm7, %v1340_v54, 1326507024  ;;  %v146_v41 = vmul.f32 %v127_v62, %v3903_v39  ;;  %v3770_v43 = vpop.eup %3769 }
 0x1bf   :  { %v1273_v45 = vclz %v3567_v1  ;;  %v1345_v52 = vsel %vm1341_vm6, %v1325_v61, %v1328_v9  ;;  %v1347_v63 = vsel %vm1343_vm9, %v1331_v3, %v1346_v33  ;;  %v5062_v21 = vadd.f32 %v145_v15, %v3897_v36  ;;  %v3772_v23 = vpop.eup %3771 }
 0x1c0   :  { %v1201_v6 = vxor.u32 2147483648, %v3770_v43  ;;  %v1355_v31 = vsel %vm1343_vm9, %v1337_v44, %v1354_v7  ;;  %v5066_v12 = vmul.u32.u64.low %v1357_v13, %v1352_v14  ;;  %v5067_v42 = vmul.u32.u64.high %v1357_v13, %v1352_v14, %v5066_v12 }
 0x1c1   :  { %v1198_v55 = vxor.u32 2147483648, %v3772_v23  ;;  %v1261_v50 = vadd.s32 %v4962_v0, %v4969_v8  ;;  %v3568_v48 = vadd.s32 4294967294, %v1273_v45  ;;  %v1356_v16 = vsel %vm1342_vm10, %v1353_v49, %v1355_v31 }
 0x1c2   :  { %v1202_v36 = vsel %vm1200_vm2, %v1201_v6, %v3772_v23  ;;  %v2872_v58 = vsel %vm2870_vm0, %v1201_v6, %v3772_v23  ;;  %v5078_v27 = vmul.u32.u64.low %v1357_v13, %v1356_v16  ;;  %v5079_v9 = vmul.u32.u64.high %v1357_v13, %v1356_v16, %v5078_v27 }
 0x1c3   :  { %v1199_v3 = vsel %vm1197_vm1, %v3770_v43, %v1198_v55  ;;  %v2869_v18 = vsel %vm2867_vm3, %v3770_v43, %v1198_v55  ;;  %vm3569_vm11 = vcmp.lt.s32.totalorder %v3568_v48, 0  ;;  %v1348_v0 = vsel %vm1342_vm10, %v1345_v52, %v1347_v63  ;;  %v5122_v55 = vpop.permute.xlu0 %130 }
 0x1c4   :  { %v1203_v8 = vsel %vm1196_vm4, %v1199_v3, %v1202_v36  ;;  %v2873_v10 = vsel %vm2866_vm5, %v2869_v18, %v2872_v58  ;;  %v1276_v59 = vsel %vm3569_vm11, 0, %v3568_v48  ;;  %v1367_v60 = vadd.s32 1, %v5067_v42 }
 0x1c5   :  { %v1204_v28 = vsel %vm1193_vm8, nan, %v1203_v8  ;;  %v2874_v62 = vsel %vm1193_vm8, nan, %v2873_v10  ;;  %v1277_v20 = vsub.s32 32, %v1276_v59  ;;  %v1291_v44 = vsub.s32 4, %v5018_v24 }
 0x1c6   :  { %1838 = vst [vmem:[#allocation2 + $0x48] sm:$0xff] %v1204_v28  ;;  %3502 = vst [vmem:[#allocation2 + $0xc8] sm:$0xff] %v2874_v62  ;;  %v1281_v29 = vsub.s32 4294967266, %v1276_v59  ;;  %v1364_v57 = vmul.u32 %v1357_v13, %v1348_v0  ;;  %vm1366_vm12 = vc.u32 %v5079_v9, %v5066_v12  ;;  %vm1207_vm13 = vcmp.lt.s32.totalorder %v4738_v4, 0 }
 0x1c7   :  { %v1279_v19 = vshrl.u32 %v1261_v50, %v1277_v20  ;;  %v1368_v54 = vsel %vm1366_vm12, %v1367_v60, %v5067_v42  ;;  %v5102_v30 = vadd.f32 %v146_v41, %v3899_v37  ;;  %v1278_v25 = vshll.u32 %v5032_v2, %v1276_v59 }
 0x1c8   :  { %v1282_v15 = vadd.s32 127, %v1281_v29  ;;  %v1369_v33 = vadd.s32 %v1368_v54, %v1364_v57  ;;  %v1416_v46 = vand.u32 2139095040, %v5062_v21  ;;  %v1292_v13 = vsel %vm1207_vm13, %v1291_v44, %v5018_v24 }
 0x1c9   :  { %v1413_v11 = vand.u32 2147483647, %v5062_v21  ;;  %v1280_v1 = vor.u32 %v1279_v19, %v1278_v25  ;;  %vm5112_vm14 = vcmp.le.f32.partialorder %v1205_v5, 0.7853982  ;;  %v1520_v2 = vand.u32 2139095040, %v5102_v30 }
 0x1ca   :  { %v1283_v61 = vshll.u32 %v1282_v15, 23  ;;  %v1370_v51 = vadd.s32 536870912, %v1369_v33  ;;  %v1417_v14 = vshrl.u32 %v1416_v46, 23  ;;  %v1294_v7 = vsel %vm5112_vm14, 0, %v1292_v13 }
 0x1cb   :  { %v1420_v43 = vand.u32 8388607, %v1413_v11  ;;  %v1517_v45 = vand.u32 2147483647, %v5102_v30  ;;  %v1521_v52 = vshrl.u32 %v1520_v2, 23  ;;  %v1287_v23 = vcvt.s32.f32 %v1280_v1 }
 0x1cc   :  { %v1284_v49 = vor.u32 4788187, %v1283_v61  ;;  %v1371_v41 = vshrl.u32 %v1370_v51, 30  ;;  %v3574_v24 = vadd.s32 4294967169, %v1417_v14  ;;  %v1298_v31 = vadd.s32 3, %v1294_v7 }
 0x1cd   :  { %v3578_v16 = vadd.s32 4294967169, %v1521_v52  ;;  %vm5128_vm0 = vcmp.le.f32.partialorder %v1309_v53, 0.7853982  ;;  %v1421_v58 = vor.u32 8388608, %v1420_v43  ;;  %v5135_v0 = vand.u32 8388607, %v1517_v45 }
 0x1ce   :  { %v1285_v63 = vand.u32 2147483647, %v1284_v49  ;;  %v1372_v5 = vshll.u32 %v1371_v41, 30  ;;  %v1423_v6 = vadd.s32 1, %v3574_v24  ;;  %v1395_v42 = vsub.s32 4, %v1371_v41 }
 0x1cf   :  { %v147_v8 = vmul.f32 %v5122_v55, %v3901_v38  ;;  %v5139_v10 = vand.u32 3, %v1298_v31  ;;  %vm1311_vm1 = vcmp.lt.s32.totalorder %v4872_v56, 0  ;;  %v5142_v53 = vand.u32 3, %v1294_v7 }
 0x1d0   :  { %v1288_v50 = vmul.f32 %v1287_v23, %v1285_v63  ;;  %v5124_v48 = vsub.s32 %v1369_v33, %v1372_v5  ;;  %vm1424_vm15 = vcmp.gt.s32.totalorder %v1423_v6, 0  ;;  %v1396_v62 = vsel %vm1311_vm1, %v1395_v42, %v1371_v41 }
 0x1d1   :  { %v1425_v27 = vsel %vm1424_vm15, %v1423_v6, 0  ;;  %v5149_v20 = vadd.s32 1, %v3578_v16  ;;  %v1365_v44 = vadd.s32 %v5066_v12, %v5079_v9  ;;  %v5156_v57 = vshll.u32 %v1421_v58, 8 }
 0x1d2   :  { %v1289_v3 = vxor.u32 2147483648, %v1288_v50  ;;  %v1375_v18 = vsub.s32 0, %v5124_v48  ;;  %v1427_v59 = vand.u32 31, %v1425_v27  ;;  %v1525_v54 = vor.u32 8388608, %v5135_v0 }
 0x1d3   :  { %v5160_v25 = vadd.f32 %v147_v8, %v3893_v34  ;;  %v5164_v15 = vsel %vm5128_vm0, 0, %v1396_v62  ;;  %v1426_v33 = vshrl.u32 %v1425_v27, 5  ;;  %vm1528_vm2 = vcmp.gt.s32.totalorder %v5149_v20, 0 }
 0x1d4   :  { %v1290_v60 = vsel %vm1207_vm13, %v1289_v3, %v1288_v50  ;;  %v3571_v28 = vmin.u32 %v1375_v18, %v5124_v48  ;;  %v1428_v29 = vsub.s32 32, %v1427_v59  ;;  %v1430_v46 = vshll.u32 %v3823_v17, %v1427_v59 }
 0x1d5   :  { %v1293_v38 = vsel %vm5112_vm14, %v4738_v4, %v1290_v60  ;;  %v1433_v9 = vshll.u32 %v3824_v22, %v1427_v59  ;;  %v1436_v34 = vshll.u32 %v3825_v26, %v1427_v59  ;;  %v1439_v51 = vshll.u32 %v3826_v32, %v1427_v59 }
 0x1d6   :  { %3773 = vcosq.f32 %v1293_v38  ;;  %v1377_v19 = vclz %v3571_v28  ;;  %v1431_v12 = vshrl.u32 %v3824_v22, %v1428_v29  ;;  %v1434_v1 = vshrl.u32 %v3825_v26, %v1428_v29 }
 0x1d7   :  { %3775 = vsinq.f32 %v1293_v38  ;;  %v1437_v61 = vshrl.u32 %v3826_v32, %v1428_v29  ;;  %v1440_v14 = vshrl.u32 %v3827_v40, %v1428_v29  ;;  %vm1304_vm3 = vcmp.eq.s32.totalorder %v5139_v10, 2 }
 0x1d8   :  { %v3572_v13 = vadd.s32 4294967294, %v1377_v19  ;;  %vm2973_vm5 = vcmp.eq.s32.totalorder %v5142_v53, 2  ;;  %v1432_v37 = vor.u32 %v1431_v12, %v1430_v46  ;;  %v1435_v2 = vor.u32 %v1434_v1, %v1433_v9 }
 0x1d9   :  { %v1442_v49 = vshll.u32 %v3827_v40, %v1427_v59  ;;  %vm1301_vm6 = vcmp.eq.s32.totalorder %v5139_v10, 0  ;;  %vm2970_vm7 = vcmp.eq.s32.totalorder %v5142_v53, 0  ;;  %v1438_v41 = vor.u32 %v1437_v61, %v1436_v34 }
 0x1da   :  { %vm3573_vm4 = vcmp.lt.s32.totalorder %v3572_v13, 0  ;;  %v1441_v24 = vor.u32 %v1440_v14, %v1439_v51  ;;  %v1443_v43 = vshrl.u32 %v3828_v47, %v1428_v29  ;;  %vm1300_vm8 = vcmp.lt.s32.totalorder %v5139_v10, 2 }
 0x1db   :  { %v1380_v7 = vsel %vm3573_vm4, 0, %v3572_v13  ;;  %vm2969_vm9 = vcmp.lt.s32.totalorder %v5142_v53, 2  ;;  %v1429_v5 = vshrl.u32 %v3823_v17, %v1428_v29  ;;  %vm1297_vm10 = vweird.f32 %v4738_v4 }
 0x1dc   :  { %v1381_v52 = vsub.s32 32, %v1380_v7  ;;  %v1382_v63 = vshll.u32 %v5124_v48, %v1380_v7  ;;  %v1385_v23 = vsub.s32 4294967266, %v1380_v7  ;;  %v1444_v6 = vor.u32 %v1443_v43, %v1442_v49 }
 0x1dd   :  { %vm1445_vm11 = vcmp.lt.s32.totalorder %v1426_v33, 1  ;;  %vm1447_vm12 = vcmp.lt.s32.totalorder %v1426_v33, 3  ;;  %vm1448_vm13 = vcmp.lt.s32.totalorder %v1426_v33, 4  ;;  %vm1446_vm14 = vcmp.lt.s32.totalorder %v1426_v33, 2 }
 0x1de   :  { %v1383_v31 = vshrl.u32 %v1365_v44, %v1381_v52  ;;  %v1386_v42 = vadd.s32 127, %v1385_v23  ;;  %v1449_v50 = vsel %vm1445_vm11, %v1429_v5, %v1432_v37  ;;  %v1450_v16 = vsel %vm1448_vm13, %v1438_v41, 2102212464 }
 0x1df   :  { %v1451_v58 = vsel %vm1447_vm12, %v1435_v2, %v1450_v16  ;;  %v1453_v48 = vsel %vm1445_vm11, %v1432_v37, %v1435_v2  ;;  %v1454_v27 = vsel %vm1448_vm13, %v1441_v24, 920167782  ;;  %v1457_v59 = vsel %vm1445_vm11, %v1435_v2, %v1438_v41 }
 0x1e0   :  { %v3774_v3 = vpop.eup %3773  ;;  %v1384_v18 = vor.u32 %v1383_v31, %v1382_v63  ;;  %v1387_v0 = vshll.u32 %v1386_v42, 23  ;;  %v1455_v8 = vsel %vm1447_vm12, %v1438_v41, %v1454_v27  ;;  %v1452_v62 = vsel %vm1446_vm14, %v1449_v50, %v1451_v58 }
 0x1e1   :  { %v3776_v60 = vpop.eup %3775  ;;  %v1305_v28 = vxor.u32 2147483648, %v3774_v3  ;;  %v1458_v38 = vsel %vm1448_vm13, %v1444_v6, 1326507024  ;;  %v5192_v44 = vshll.u32 %v1525_v54, 8  ;;  %v1456_v46 = vsel %vm1446_vm14, %v1453_v48, %v1455_v8 }
 0x1e2   :  { %v1302_v29 = vxor.u32 2147483648, %v3776_v60  ;;  %v1388_v19 = vor.u32 4788187, %v1387_v0  ;;  %v1459_v13 = vsel %vm1447_vm12, %v1441_v24, %v1458_v38  ;;  %v1529_v34 = vsel %vm1528_vm2, %v5149_v20, 0 }
 0x1e3   :  { %v1306_v12 = vsel %vm1304_vm3, %v1305_v28, %v3776_v60  ;;  %v2975_v9 = vsel %vm2973_vm5, %v1305_v28, %v3776_v60  ;;  %v1460_v1 = vsel %vm1446_vm14, %v1457_v59, %v1459_v13  ;;  %v1391_v51 = vcvt.s32.f32 %v1384_v18 }
 0x1e4   :  { %v1303_v54 = vsel %vm1301_vm6, %v3774_v3, %v1302_v29  ;;  %v1389_v61 = vand.u32 2147483647, %v1388_v19  ;;  %v2972_v14 = vsel %vm2970_vm7, %v3774_v3, %v1302_v29  ;;  %v1531_v24 = vand.u32 31, %v1529_v34 }
 0x1e5   :  { %v1307_v37 = vsel %vm1300_vm8, %v1303_v54, %v1306_v12  ;;  %v2976_v2 = vsel %vm2969_vm9, %v2972_v14, %v2975_v9  ;;  %v5213_v33 = vmul.u32.u64.low %v5156_v57, %v1460_v1  ;;  %v5214_v49 = vmul.u32.u64.high %v5156_v57, %v1460_v1, %v5213_v33 }
 0x1e6   :  { %v1308_v20 = vsel %vm1297_vm10, nan, %v1307_v37  ;;  %v1392_v7 = vmul.f32 %v1391_v51, %v1389_v61  ;;  %v2977_v41 = vsel %vm1297_vm10, nan, %v2976_v2  ;;  %v1402_v43 = vadd.s32 3, %v5164_v15 }
 0x1e7   :  { %1839 = vst [vmem:[#allocation2 + $0x50] sm:$0xff] %v1308_v20  ;;  %v5222_v10 = vand.u32 3, %v5164_v15  ;;  %3503 = vst [vmem:[#allocation2 + $0xd0] sm:$0xff] %v2977_v41  ;;  %v5225_v53 = vmul.u32.u64.low %v5156_v57, %v1456_v46  ;;  %v5226_v52 = vmul.u32.u64.high %v5156_v57, %v1456_v46, %v5225_v53  ;;  %v1468_v23 = vmul.u32 %v5156_v57, %v1452_v62 }
 0x1e8   :  { %v1393_v63 = vxor.u32 2147483648, %v1392_v7  ;;  %v1530_v5 = vshrl.u32 %v1529_v34, 5  ;;  %v1532_v6 = vsub.s32 32, %v1531_v24  ;;  %v1534_v4 = vshll.u32 %v3823_v17, %v1531_v24 }
 0x1e9   :  { %vm1470_vm15 = vc.u32 %v5214_v49, %v5225_v53  ;;  %v1537_v31 = vshll.u32 %v3824_v22, %v1531_v24  ;;  %v1540_v15 = vshll.u32 %v3825_v26, %v1531_v24  ;;  %v1543_v57 = vshll.u32 %v3826_v32, %v1531_v24 }
 0x1ea   :  { %v1394_v42 = vsel %vm1311_vm1, %v1393_v63, %v1392_v7  ;;  %v1535_v50 = vshrl.u32 %v3824_v22, %v1532_v6  ;;  %v1538_v16 = vshrl.u32 %v3825_v26, %v1532_v6  ;;  %v1471_v48 = vadd.s32 1, %v5226_v52 }
 0x1eb   :  { %v1397_v58 = vsel %vm5128_vm0, %v4872_v56, %v1394_v42  ;;  %v1541_v27 = vshrl.u32 %v3826_v32, %v1532_v6  ;;  %v1544_v3 = vshrl.u32 %v3827_v40, %v1532_v6  ;;  %vm1549_vm1 = vcmp.lt.s32.totalorder %v1530_v5, 1 }
 0x1ec   :  { %3777 = vcosq.f32 %v1397_v58  ;;  %v1536_v18 = vor.u32 %v1535_v50, %v1534_v4  ;;  %v1539_v0 = vor.u32 %v1538_v16, %v1537_v31  ;;  %v1472_v8 = vsel %vm1470_vm15, %v1471_v48, %v5226_v52 }
 0x1ed   :  { %3779 = vsinq.f32 %v1397_v58  ;;  %v1542_v59 = vor.u32 %v1541_v27, %v1540_v15  ;;  %v1545_v60 = vor.u32 %v1544_v3, %v1543_v57  ;;  %v1473_v36 = vadd.s32 %v1472_v8, %v1468_v23 }
 0x1ee   :  { %v1546_v28 = vshll.u32 %v3827_v40, %v1531_v24  ;;  %v1547_v62 = vshrl.u32 %v3828_v47, %v1532_v6  ;;  %vm1552_vm0 = vcmp.lt.s32.totalorder %v1530_v5, 4  ;;  %vm1550_vm2 = vcmp.lt.s32.totalorder %v1530_v5, 2 }
 0x1ef   :  { %vm1551_vm3 = vcmp.lt.s32.totalorder %v1530_v5, 3  ;;  %v1557_v38 = vsel %vm1549_vm1, %v1536_v18, %v1539_v0  ;;  %v1558_v29 = vsel %vm1552_vm0, %v1545_v60, 920167782  ;;  %v1474_v19 = vadd.s32 536870912, %v1473_v36 }
 0x1f0   :  { %v1548_v46 = vor.u32 %v1547_v62, %v1546_v28  ;;  %v1554_v13 = vsel %vm1552_vm0, %v1542_v59, 2102212464  ;;  %v1559_v12 = vsel %vm1551_vm3, %v1542_v59, %v1558_v29  ;;  %v1403_v9 = vand.u32 3, %v1402_v43 }
 0x1f1   :  { %v1533_v1 = vshrl.u32 %v3823_v17, %v1532_v6  ;;  %v1560_v34 = vsel %vm1550_vm2, %v1557_v38, %v1559_v12  ;;  %v1561_v54 = vsel %vm1549_vm1, %v1539_v0, %v1542_v59  ;;  %v1475_v61 = vshrl.u32 %v1474_v19, 30 }
 0x1f2   :  { %v1562_v51 = vsel %vm1552_vm0, %v1548_v46, 1326507024  ;;  %v5258_v14 = vmul.u32.u64.low %v5192_v44, %v1560_v34  ;;  %v5259_v37 = vmul.u32.u64.high %v5192_v44, %v1560_v34, %v5258_v14  ;;  %v1555_v33 = vsel %vm1551_vm3, %v1539_v0, %v1554_v13 }
 0x1f3   :  { %v1553_v2 = vsel %vm1549_vm1, %v1533_v1, %v1536_v18  ;;  %v1563_v20 = vsel %vm1551_vm3, %v1545_v60, %v1562_v51  ;;  %v1624_v7 = vand.u32 2139095040, %v5160_v25  ;;  %vm1401_vm4 = vweird.f32 %v4872_v56 }
 0x1f4   :  { %v1476_v41 = vshll.u32 %v1475_v61, 30  ;;  %v1564_v24 = vsel %vm1550_vm2, %v1561_v54, %v1563_v20  ;;  %v148_v43 = vmul.f32 %v5122_v55, %v3903_v39  ;;  %vm3072_vm5 = vcmp.lt.s32.totalorder %v5222_v10, 2 }
 0x1f5   :  { %v5272_v52 = vmul.u32.u64.low %v5192_v44, %v1564_v24  ;;  %v5273_v63 = vmul.u32.u64.high %v5192_v44, %v1564_v24, %v5272_v52  ;;  %v1621_v23 = vand.u32 2147483647, %v5160_v25  ;;  %vm3073_vm6 = vcmp.eq.s32.totalorder %v5222_v10, 0 }
 0x1f6   :  { %v3778_v6 = vpop.eup %3777  ;;  %v1477_v4 = vsub.s32 %v1473_v36, %v1476_v41  ;;  %v1556_v31 = vsel %vm1550_vm2, %v1553_v2, %v1555_v33  ;;  %v1625_v15 = vshrl.u32 %v1624_v7, 23  ;;  %vm1404_vm7 = vcmp.lt.s32.totalorder %v1403_v9, 2 }
 0x1f7   :  { %v3780_v42 = vpop.eup %3779  ;;  %v1409_v50 = vxor.u32 2147483648, %v3778_v6  ;;  %vm3076_vm8 = vcmp.eq.s32.totalorder %v5222_v10, 2  ;;  %v1575_v39 = vadd.s32 1, %v5259_v37  ;;  %vm1405_vm9 = vcmp.eq.s32.totalorder %v1403_v9, 0 }
 0x1f8   :  { %v1406_v55 = vxor.u32 2147483648, %v3780_v42  ;;  %vm1408_vm10 = vcmp.eq.s32.totalorder %v1403_v9, 2  ;;  %v1479_v16 = vsub.s32 0, %v1477_v4  ;;  %v1572_v48 = vmul.u32 %v5192_v44, %v1556_v31 }
 0x1f9   :  { %v1410_v57 = vsel %vm1408_vm10, %v1409_v50, %v3780_v42  ;;  %v3078_v58 = vsel %vm3076_vm8, %v1409_v50, %v3780_v42  ;;  %vm1574_vm11 = vc.u32 %v5273_v63, %v5258_v14  ;;  %v3582_v18 = vadd.s32 4294967169, %v1625_v15 }
 0x1fa   :  { %v1407_v5 = vsel %vm1405_vm9, %v3778_v6, %v1406_v55  ;;  %v3075_v27 = vsel %vm3073_vm6, %v3778_v6, %v1406_v55  ;;  %v3575_v3 = vmin.u32 %v1479_v16, %v1477_v4  ;;  %v1499_v59 = vsub.s32 4, %v1475_v61 }
 0x1fb   :  { %v1411_v0 = vsel %vm1404_vm7, %v1407_v5, %v1410_v57  ;;  %v3079_v8 = vsel %vm3072_vm5, %v3075_v27, %v3078_v58  ;;  %v1576_v60 = vsel %vm1574_vm11, %v1575_v39, %v5259_v37  ;;  %v5294_v38 = vadd.f32 %v148_v43, %v3895_v35 }
 0x1fc   :  { %v1412_v44 = vsel %vm1401_vm4, nan, %v1411_v0  ;;  %v3080_v36 = vsel %vm1401_vm4, nan, %v3079_v8  ;;  %v1481_v28 = vclz %v3575_v3  ;;  %v1577_v62 = vadd.s32 %v1576_v60, %v1572_v48 }
 0x1fd   :  { %1840 = vst [vmem:[#allocation2 + $0x58] sm:$0xff] %v1412_v44  ;;  %3504 = vst [vmem:[#allocation2 + $0xd8] sm:$0xff] %v3080_v36  ;;  %vm1415_vm12 = vcmp.lt.s32.totalorder %v5062_v21, 0  ;;  %v1631_v29 = vadd.s32 1, %v3582_v18  ;;  %v1628_v13 = vand.u32 8388607, %v1621_v23  ;;  %v1469_v34 = vadd.s32 %v5225_v53, %v5214_v49 }
 0x1fe   :  { %v3576_v10 = vadd.s32 4294967294, %v1481_v28  ;;  %v1500_v19 = vsel %vm1415_vm12, %v1499_v59, %v1475_v61  ;;  %v1578_v46 = vadd.s32 536870912, %v1577_v62  ;;  %vm5303_vm13 = vcmp.le.f32.partialorder %v1413_v11, 0.7853982 }
 0x1ff   :  { %vm1632_vm15 = vcmp.gt.s32.totalorder %v1631_v29, 0  ;;  %v1728_v1 = vand.u32 2139095040, %v5294_v38  ;;  %v1502_v51 = vsel %vm5303_vm13, 0, %v1500_v19  ;;  %v1629_v11 = vor.u32 8388608, %v1628_v13 }
 0x200   :  { %vm3577_vm14 = vcmp.lt.s32.totalorder %v3576_v10, 0  ;;  %v1579_v12 = vshrl.u32 %v1578_v46, 30  ;;  %v1633_v9 = vsel %vm1632_vm15, %v1631_v29, 0  ;;  %v1506_v24 = vadd.s32 3, %v1502_v51 }
 0x201   :  { %v1484_v35 = vsel %vm3577_vm14, 0, %v3576_v10  ;;  %v1635_v2 = vand.u32 31, %v1633_v9  ;;  %v1729_v6 = vshrl.u32 %v1728_v1, 23  ;;  %vm1519_vm1 = vcmp.lt.s32.totalorder %v5102_v30, 0 }
 0x202   :  { %v1485_v54 = vsub.s32 32, %v1484_v35  ;;  %v1489_v61 = vsub.s32 4294967266, %v1484_v35  ;;  %v1580_v37 = vshll.u32 %v1579_v12, 30  ;;  %v1486_v33 = vshll.u32 %v1477_v4, %v1484_v35 }
 0x203   :  { %v1603_v41 = vsub.s32 4, %v1579_v12  ;;  %v1636_v52 = vsub.s32 32, %v1635_v2  ;;  %vm5317_vm0 = vcmp.le.f32.partialorder %v1517_v45, 0.7853982  ;;  %v5322_v4 = vand.u32 3, %v1502_v51 }
 0x204   :  { %v1487_v20 = vshrl.u32 %v1469_v34, %v1485_v54  ;;  %v1490_v7 = vadd.s32 127, %v1489_v61  ;;  %v5312_v43 = vsub.s32 %v1577_v62, %v1580_v37  ;;  %v5324_v42 = vshrl.u32 %v1633_v9, 5 }
 0x205   :  { %v1573_v39 = vadd.s32 %v5258_v14, %v5273_v63  ;;  %v1604_v55 = vsel %vm1519_vm1, %v1603_v41, %v1579_v12  ;;  %v1639_v16 = vshrl.u32 %v3824_v22, %v1636_v52  ;;  %v5331_v57 = vand.u32 3, %v1506_v24 }
 0x206   :  { %v1488_v31 = vor.u32 %v1487_v20, %v1486_v33  ;;  %v1491_v15 = vshll.u32 %v1490_v7, 23  ;;  %v1583_v53 = vsub.s32 0, %v5312_v43  ;;  %v5334_v58 = vshll.u32 %v1629_v11, 8 }
 0x207   :  { %v3586_v48 = vadd.s32 4294967169, %v1729_v6  ;;  %v1638_v3 = vshll.u32 %v3823_v17, %v1635_v2  ;;  %v1642_v18 = vshrl.u32 %v3825_v26, %v1636_v52  ;;  %v5340_v14 = vsel %vm5317_vm0, 0, %v1604_v55 }
 0x208   :  { %v1492_v50 = vor.u32 4788187, %v1491_v15  ;;  %v3579_v45 = vmin.u32 %v1583_v53, %v5312_v43  ;;  %v1495_v27 = vcvt.s32.f32 %v1488_v31  ;;  %v1641_v63 = vshll.u32 %v3824_v22, %v1635_v2 }
 0x209   :  { %vm1653_vm2 = vcmp.lt.s32.totalorder %v5324_v42, 1  ;;  %v1640_v59 = vor.u32 %v1639_v16, %v1638_v3  ;;  %v1644_v60 = vshll.u32 %v3825_v26, %v1635_v2  ;;  %v1645_v44 = vshrl.u32 %v3826_v32, %v1636_v52 }
 0x20a   :  { %v1493_v5 = vand.u32 2147483647, %v1492_v50  ;;  %v1585_v0 = vclz %v3579_v45  ;;  %vm1654_vm3 = vcmp.lt.s32.totalorder %v5324_v42, 2  ;;  %v1647_v28 = vshll.u32 %v3826_v32, %v1635_v2 }
 0x20b   :  { %v1648_v62 = vshrl.u32 %v3827_v40, %v1636_v52  ;;  %v1651_v10 = vshrl.u32 %v3828_v47, %v1636_v52  ;;  %v1643_v19 = vor.u32 %v1642_v18, %v1641_v63  ;;  %v1646_v46 = vor.u32 %v1645_v44, %v1644_v60 }
 0x20c   :  { %v1496_v8 = vmul.f32 %v1495_v27, %v1493_v5  ;;  %v3580_v36 = vadd.s32 4294967294, %v1585_v0  ;;  %v1650_v13 = vshll.u32 %v3827_v40, %v1635_v2  ;;  %v1637_v35 = vshrl.u32 %v3823_v17, %v1636_v52 }
 0x20d   :  { %v1649_v12 = vor.u32 %v1648_v62, %v1647_v28  ;;  %vm1655_vm5 = vcmp.lt.s32.totalorder %v5324_v42, 3  ;;  %vm1656_vm6 = vcmp.lt.s32.totalorder %v5324_v42, 4  ;;  %v1661_v2 = vsel %vm1653_vm2, %v1640_v59, %v1643_v19 }
 0x20e   :  { %v1497_v29 = vxor.u32 2147483648, %v1496_v8  ;;  %vm3581_vm4 = vcmp.lt.s32.totalorder %v3580_v36, 0  ;;  %v1652_v34 = vor.u32 %v1651_v10, %v1650_v13  ;;  %v1658_v37 = vsel %vm1656_vm6, %v1646_v46, 2102212464 }
 0x20f   :  { %v1588_v1 = vsel %vm3581_vm4, 0, %v3580_v36  ;;  %v1662_v33 = vsel %vm1656_vm6, %v1649_v12, 920167782  ;;  %v1665_v56 = vsel %vm1653_vm2, %v1643_v19, %v1646_v46  ;;  %v1657_v41 = vsel %vm1653_vm2, %v1637_v35, %v1640_v59 }
 0x210   :  { %v1498_v9 = vsel %vm1415_vm12, %v1497_v29, %v1496_v8  ;;  %v1589_v61 = vsub.s32 32, %v1588_v1  ;;  %v1593_v51 = vsub.s32 4294967266, %v1588_v1  ;;  %v1590_v11 = vshll.u32 %v5312_v43, %v1588_v1 }
 0x211   :  { %v1501_v54 = vsel %vm5303_vm13, %v5062_v21, %v1498_v9  ;;  %v1659_v24 = vsel %vm1655_vm5, %v1643_v19, %v1658_v37  ;;  %v1663_v43 = vsel %vm1655_vm5, %v1646_v46, %v1662_v33  ;;  %v1666_v52 = vsel %vm1656_vm6, %v1652_v34, 1326507024 }
 0x212   :  { %3781 = vcosq.f32 %v1501_v54  ;;  %v1591_v20 = vshrl.u32 %v1573_v39, %v1589_v61  ;;  %v1594_v7 = vadd.s32 127, %v1593_v51  ;;  %v1664_v15 = vsel %vm1654_vm3, %v1661_v2, %v1663_v43 }
 0x213   :  { %3783 = vsinq.f32 %v1501_v54  ;;  %v1667_v53 = vsel %vm1655_vm5, %v1649_v12, %v1666_v52  ;;  %v5383_v39 = vmul.u32.u64.low %v5334_v58, %v1664_v15  ;;  %v5384_v55 = vmul.u32.u64.high %v5334_v58, %v1664_v15, %v5383_v39 }
 0x214   :  { %v1592_v6 = vor.u32 %v1591_v20, %v1590_v11  ;;  %v1595_v31 = vshll.u32 %v1594_v7, 23  ;;  %v1668_v50 = vsel %vm1654_vm3, %v1665_v56, %v1667_v53  ;;  %v1735_v16 = vadd.s32 1, %v3586_v48 }
 0x215   :  { %v5388_v5 = vmul.u32.u64.low %v5334_v58, %v1668_v50  ;;  %v5389_v27 = vmul.u32.u64.high %v5334_v58, %v1668_v50, %v5388_v5  ;;  %v1725_v3 = vand.u32 2147483647, %v5294_v38  ;;  %vm1508_vm7 = vcmp.lt.s32.totalorder %v5331_v57, 2 }
 0x216   :  { %v1596_v45 = vor.u32 4788187, %v1595_v31  ;;  %vm1509_vm8 = vcmp.eq.s32.totalorder %v5331_v57, 0  ;;  %v1610_v18 = vadd.s32 3, %v5340_v14  ;;  %vm3175_vm9 = vcmp.lt.s32.totalorder %v5322_v4, 2 }
 0x217   :  { %v1660_v0 = vsel %vm1654_vm3, %v1657_v41, %v1659_v24  ;;  %vm1736_vm10 = vcmp.gt.s32.totalorder %v1735_v16, 0  ;;  %vm1505_vm11 = vweird.f32 %v5062_v21  ;;  %vm1512_vm12 = vcmp.eq.s32.totalorder %v5331_v57, 2 }
 0x218   :  { %v1597_v48 = vand.u32 2147483647, %v1596_v45  ;;  %v1599_v63 = vcvt.s32.f32 %v1592_v6  ;;  %v1737_v8 = vsel %vm1736_vm10, %v1735_v16, 0  ;;  %vm3176_vm13 = vcmp.eq.s32.totalorder %v5322_v4, 0 }
 0x219   :  { %vm3179_vm14 = vcmp.eq.s32.totalorder %v5322_v4, 2  ;;  %v1679_v59 = vadd.s32 1, %v5384_v55  ;;  %v1739_v60 = vand.u32 31, %v1737_v8  ;;  %v1676_v36 = vmul.u32 %v5334_v58, %v1660_v0 }
 0x21a   :  { %v1600_v44 = vmul.f32 %v1599_v63, %v1597_v48  ;;  %vm1678_vm15 = vc.u32 %v5389_v27, %v5383_v39  ;;  %v5408_v42 = vand.u32 8388607, %v1725_v3  ;;  %v5410_v62 = vand.u32 3, %v1610_v18 }
 0x21b   :  { %v5413_v10 = vand.u32 3, %v5340_v14  ;;  %v1680_v29 = vsel %vm1678_vm15, %v1679_v59, %v5384_v55  ;;  %v1740_v19 = vsub.s32 32, %v1739_v60  ;;  %v5416_v12 = vshrl.u32 %v1737_v8, 5 }
 0x21c   :  { %v3782_v28 = vpop.eup %3781  ;;  %v1601_v35 = vxor.u32 2147483648, %v1600_v44  ;;  %v1681_v58 = vadd.s32 %v1680_v29, %v1676_v36  ;;  %v1742_v1 = vshll.u32 %v3823_v17, %v1739_v60  ;;  %v1745_v20 = vshll.u32 %v3824_v22, %v1739_v60 }
 0x21d   :  { %v3784_v46 = vpop.eup %3783  ;;  %v1513_v13 = vxor.u32 2147483648, %v3782_v28  ;;  %v1743_v34 = vshrl.u32 %v3824_v22, %v1740_v19  ;;  %v1746_v54 = vshrl.u32 %v3825_v26, %v1740_v19  ;;  %v1748_v43 = vshll.u32 %v3825_v26, %v1739_v60 }
 0x21e   :  { %v1510_v9 = vxor.u32 2147483648, %v3784_v46  ;;  %v1602_v61 = vsel %vm1519_vm1, %v1601_v35, %v1600_v44  ;;  %v1682_v37 = vadd.s32 536870912, %v1681_v58  ;;  %v1749_v4 = vshrl.u32 %v3826_v32, %v1740_v19 }
 0x21f   :  { %v1514_v14 = vsel %vm1512_vm12, %v1513_v13, %v3784_v46  ;;  %v3181_v51 = vsel %vm3179_vm14, %v1513_v13, %v3784_v46  ;;  %v1605_v2 = vsel %vm5317_vm0, %v5102_v30, %v1602_v61  ;;  %v1744_v57 = vor.u32 %v1743_v34, %v1742_v1 }
 0x220   :  { %v1511_v11 = vsel %vm1509_vm8, %v3782_v28, %v1510_v9  ;;  %v3178_v33 = vsel %vm3176_vm13, %v3782_v28, %v1510_v9  ;;  %3785 = vcosq.f32 %v1605_v2  ;;  %v5439_v41 = vshrl.u32 %v1682_v37, 30 }
 0x221   :  { %v1515_v7 = vsel %vm1508_vm7, %v1511_v11, %v1514_v14  ;;  %v3182_v56 = vsel %vm3175_vm9, %v3178_v33, %v3181_v51  ;;  %3787 = vsinq.f32 %v1605_v2  ;;  %v1747_v52 = vor.u32 %v1746_v54, %v1745_v20 }
 0x222   :  { %v1516_v24 = vsel %vm1505_vm11, nan, %v1515_v7  ;;  %v3183_v49 = vsel %vm1505_vm11, nan, %v3182_v56  ;;  %v1684_v22 = vshll.u32 %v5439_v41, 30  ;;  %v1751_v6 = vshll.u32 %v3826_v32, %v1739_v60 }
 0x223   :  { %1841 = vst [vmem:[#allocation2 + $0x60] sm:$0xff] %v1516_v24  ;;  %3505 = vst [vmem:[#allocation2 + $0xe0] sm:$0xff] %v3183_v49  ;;  %v1752_v31 = vshrl.u32 %v3827_v40, %v1740_v19  ;;  %v1754_v15 = vshll.u32 %v3827_v40, %v1739_v60  ;;  %v1755_v53 = vshrl.u32 %v3828_v47, %v1740_v19  ;;  %vm3279_vm1 = vcmp.eq.s32.totalorder %v5413_v10, 0 }
 0x224   :  { %v5452_v21 = vsub.s32 %v1681_v58, %v1684_v22  ;;  %v1750_v50 = vor.u32 %v1749_v4, %v1748_v43  ;;  %vm3282_vm0 = vcmp.eq.s32.totalorder %v5413_v10, 2  ;;  %v1733_v26 = vor.u32 8388608, %v5408_v42 }
 0x225   :  { %v1753_v55 = vor.u32 %v1752_v31, %v1751_v6  ;;  %v1756_v16 = vor.u32 %v1755_v53, %v1754_v15  ;;  %vm1612_vm2 = vcmp.lt.s32.totalorder %v5410_v62, 2  ;;  %vm3278_vm3 = vcmp.lt.s32.totalorder %v5413_v10, 2 }
 0x226   :  { %v1687_v32 = vsub.s32 0, %v5452_v21  ;;  %vm1757_vm4 = vcmp.lt.s32.totalorder %v5416_v12, 1  ;;  %vm1760_vm5 = vcmp.lt.s32.totalorder %v5416_v12, 4  ;;  %vm1609_vm6 = vweird.f32 %v5102_v30 }
 0x227   :  { %vm1759_vm7 = vcmp.lt.s32.totalorder %v5416_v12, 3  ;;  %v1762_v40 = vsel %vm1760_vm5, %v1750_v50, 2102212464  ;;  %v1765_v47 = vsel %vm1757_vm4, %v1744_v57, %v1747_v52  ;;  %v1766_v45 = vsel %vm1760_vm5, %v1753_v55, 920167782 }
 0x228   :  { %v3583_v5 = vmin.u32 %v1687_v32, %v5452_v21  ;;  %v1741_v18 = vshrl.u32 %v3823_v17, %v1740_v19  ;;  %vm1758_vm8 = vcmp.lt.s32.totalorder %v5416_v12, 2  ;;  %v1767_v0 = vsel %vm1759_vm7, %v1750_v50, %v1766_v45 }
 0x229   :  { %v1768_v48 = vsel %vm1758_vm8, %v1765_v47, %v1767_v0  ;;  %v1769_v63 = vsel %vm1757_vm4, %v1747_v52, %v1750_v50  ;;  %v1770_v8 = vsel %vm1760_vm5, %v1756_v16, 1326507024  ;;  %v1773_v59 = vshll.u32 %v1733_v26, 8 }
 0x22a   :  { %v3786_v60 = vpop.eup %3785  ;;  %vm1613_vm9 = vcmp.eq.s32.totalorder %v5410_v62, 0  ;;  %v1689_v44 = vclz %v3583_v5  ;;  %v1761_v17 = vsel %vm1757_vm4, %v1741_v18, %v1744_v57  ;;  %v1763_v36 = vsel %vm1759_vm7, %v1747_v52, %v1762_v40 }
 0x22b   :  { %v3788_v42 = vpop.eup %3787  ;;  %v1617_v28 = vxor.u32 2147483648, %v3786_v60  ;;  %v1771_v29 = vsel %vm1759_vm7, %v1753_v55, %v1770_v8  ;;  %v5482_v19 = vmul.u32.u64.low %v1773_v59, %v1768_v48  ;;  %v5483_v46 = vmul.u32.u64.high %v1773_v59, %v1768_v48, %v5482_v19 }
 0x22c   :  { %v1614_v13 = vxor.u32 2147483648, %v3788_v42  ;;  %vm1616_vm10 = vcmp.eq.s32.totalorder %v5410_v62, 2  ;;  %v3584_v35 = vadd.s32 4294967294, %v1689_v44  ;;  %v1772_v58 = vsel %vm1758_vm8, %v1769_v63, %v1771_v29 }
 0x22d   :  { %v1618_v9 = vsel %vm1616_vm10, %v1617_v28, %v3788_v42  ;;  %v3284_v1 = vsel %vm3282_vm0, %v1617_v28, %v3788_v42  ;;  %v5490_v34 = vmul.u32.u64.low %v1773_v59, %v1772_v58  ;;  %v5491_v54 = vmul.u32.u64.high %v1773_v59, %v1772_v58, %v5490_v34 }
 0x22e   :  { %v1615_v14 = vsel %vm1613_vm9, %v3786_v60, %v1614_v13  ;;  %v3281_v61 = vsel %vm3279_vm1, %v3786_v60, %v1614_v13  ;;  %vm3585_vm11 = vcmp.lt.s32.totalorder %v3584_v35, 0  ;;  %v1764_v51 = vsel %vm1758_vm8, %v1761_v17, %v1763_v36 }
 0x22f   :  { %v1619_v37 = vsel %vm1612_vm2, %v1615_v14, %v1618_v9  ;;  %v3285_v11 = vsel %vm3278_vm3, %v3281_v61, %v3284_v1  ;;  %v1692_v2 = vsel %vm3585_vm11, 0, %v3584_v35  ;;  %v1783_v33 = vadd.s32 1, %v5483_v46 }
 0x230   :  { %v1620_v20 = vsel %vm1609_vm6, nan, %v1619_v37  ;;  %v3286_v7 = vsel %vm1609_vm6, nan, %v3285_v11  ;;  %v1677_v56 = vadd.s32 %v5383_v39, %v5389_v27  ;;  %v1693_v12 = vsub.s32 32, %v1692_v2 }
 0x231   :  { %1842 = vst [vmem:[#allocation2 + $0x68] sm:$0xff] %v1620_v20  ;;  %3506 = vst [vmem:[#allocation2 + $0xe8] sm:$0xff] %v3286_v7  ;;  %v1697_v62 = vsub.s32 4294967266, %v1692_v2  ;;  %v1780_v24 = vmul.u32 %v1773_v59, %v1764_v51  ;;  %vm1782_vm12 = vc.u32 %v5491_v54, %v5482_v19  ;;  %v1694_v43 = vshll.u32 %v5452_v21, %v1692_v2 }
 0x232   :  { %v1695_v10 = vshrl.u32 %v1677_v56, %v1693_v12  ;;  %v1784_v49 = vsel %vm1782_vm12, %v1783_v33, %v5483_v46  ;;  %v1707_v53 = vsub.s32 4, %v5439_v41  ;;  %vm1623_vm13 = vcmp.lt.s32.totalorder %v5160_v25, 0 }
 0x233   :  { %v1698_v22 = vadd.s32 127, %v1697_v62  ;;  %v1785_v57 = vadd.s32 %v1784_v49, %v1780_v24  ;;  %vm1622_vm14 = vcmp.le.f32.partialorder %v1621_v23, 0.7853982  ;;  %v1781_v63 = vadd.s32 %v5482_v19, %v5491_v54 }
 0x234   :  { %v1696_v52 = vor.u32 %v1695_v10, %v1694_v43  ;;  %v1708_v16 = vsel %vm1623_vm13, %v1707_v53, %v5439_v41  ;;  %vm1713_vm6 = vweird.f32 %v5160_v25  ;;  %vm1727_vm7 = vcmp.lt.s32.totalorder %v5294_v38, 0 }
 0x235   :  { %v1699_v30 = vshll.u32 %v1698_v22, 23  ;;  %v1786_v4 = vadd.s32 536870912, %v1785_v57  ;;  %v1710_v45 = vsel %vm1622_vm14, 0, %v1708_v16  ;;  %vm1726_vm8 = vcmp.le.f32.partialorder %v1725_v3, 0.7853982 }
 0x236   :  { %v1703_v27 = vcvt.s32.f32 %v1696_v52  ;;  %v1714_v0 = vadd.s32 3, %v1710_v45  ;;  %v3380_v17 = vand.u32 3, %v1710_v45 }
 0x237   :  { %v1700_v6 = vor.u32 4788187, %v1699_v30  ;;  %v5513_v31 = vshrl.u32 %v1786_v4, 30 }
 0x238   :  { %v1715_v41 = vand.u32 3, %v1714_v0  ;;  %vm3385_vm3 = vcmp.eq.s32.totalorder %v3380_v17, 2  ;;  %vm3381_vm4 = vcmp.lt.s32.totalorder %v3380_v17, 2  ;;  %vm3382_vm5 = vcmp.eq.s32.totalorder %v3380_v17, 0 }
 0x239   :  { %v1701_v39 = vand.u32 2147483647, %v1700_v6  ;;  %v1788_v15 = vshll.u32 %v5513_v31, 30  ;;  %v1811_v11 = vsub.s32 4, %v5513_v31 }
 0x23a   :  { %vm1716_vm1 = vcmp.lt.s32.totalorder %v1715_v41, 2  ;;  %vm1717_vm0 = vcmp.eq.s32.totalorder %v1715_v41, 0  ;;  %vm1720_vm2 = vcmp.eq.s32.totalorder %v1715_v41, 2 }
 0x23b   :  { %v1704_v50 = vmul.f32 %v1703_v27, %v1701_v39  ;;  %v1789_v26 = vsub.s32 %v1785_v57, %v1788_v15  ;;  %v1812_v7 = vsel %vm1727_vm7, %v1811_v11, %v5513_v31 }
 0x23c   :  { %v1814_v56 = vsel %vm1726_vm8, 0, %v1812_v7 }
 0x23d   :  { %v1705_v55 = vxor.u32 2147483648, %v1704_v50  ;;  %v1791_v21 = vsub.s32 0, %v1789_v26  ;;  %v1818_v12 = vadd.s32 3, %v1814_v56  ;;  %v3483_v24 = vand.u32 3, %v1814_v56 }
 0x23f   :  { %v1706_v32 = vsel %vm1623_vm13, %v1705_v55, %v1704_v50  ;;  %v3587_v40 = vmin.u32 %v1791_v21, %v1789_v26  ;;  %v1819_v62 = vand.u32 3, %v1818_v12  ;;  %vm3488_vm10 = vcmp.eq.s32.totalorder %v3483_v24, 2 }
 0x240   :  { %v1709_v47 = vsel %vm1622_vm14, %v5160_v25, %v1706_v32  ;;  %vm3485_vm12 = vcmp.eq.s32.totalorder %v3483_v24, 0  ;;  %vm3484_vm14 = vcmp.lt.s32.totalorder %v3483_v24, 2 }
 0x241   :  { %3789 = vcosq.f32 %v1709_v47  ;;  %v1793_v5 = vclz %v3587_v40  ;;  %vm1824_vm9 = vcmp.eq.s32.totalorder %v1819_v62, 2  ;;  %vm1821_vm11 = vcmp.eq.s32.totalorder %v1819_v62, 0 }
 0x242   :  { %3791 = vsinq.f32 %v1709_v47  ;;  %vm1820_vm13 = vcmp.lt.s32.totalorder %v1819_v62, 2 }
 0x243   :  { %v3588_v18 = vadd.s32 4294967294, %v1793_v5 }
 0x245   :  { %vm3589_vm15 = vcmp.lt.s32.totalorder %v3588_v18, 0 }
 0x246   :  { %v1796_v48 = vsel %vm3589_vm15, 0, %v3588_v18  ;;  %vm1817_vm15 = vweird.f32 %v5294_v38 }
 0x247   :  { %v1797_v8 = vsub.s32 32, %v1796_v48  ;;  %v1801_v59 = vsub.s32 4294967266, %v1796_v48  ;;  %v1798_v60 = vshll.u32 %v1789_v26, %v1796_v48 }
 0x249   :  { %v1799_v44 = vshrl.u32 %v1781_v63, %v1797_v8  ;;  %v1802_v23 = vadd.s32 127, %v1801_v59 }
 0x24b   :  { %v3790_v36 = vpop.eup %3789  ;;  %v1800_v42 = vor.u32 %v1799_v44, %v1798_v60  ;;  %v1803_v28 = vshll.u32 %v1802_v23, 23 }
 0x24c   :  { %v3792_v29 = vpop.eup %3791  ;;  %v1721_v46 = vxor.u32 2147483648, %v3790_v36 }
 0x24d   :  { %v1718_v13 = vxor.u32 2147483648, %v3792_v29  ;;  %v1804_v35 = vor.u32 4788187, %v1803_v28  ;;  %v1807_v34 = vcvt.s32.f32 %v1800_v42 }
 0x24e   :  { %v1722_v58 = vsel %vm1720_vm2, %v1721_v46, %v3792_v29  ;;  %v3387_v19 = vsel %vm3385_vm3, %v1721_v46, %v3792_v29 }
 0x24f   :  { %v1719_v9 = vsel %vm1717_vm0, %v3790_v36, %v1718_v13  ;;  %v1805_v1 = vand.u32 2147483647, %v1804_v35  ;;  %v3384_v54 = vsel %vm3382_vm5, %v3790_v36, %v1718_v13 }
 0x250   :  { %v1723_v14 = vsel %vm1716_vm1, %v1719_v9, %v1722_v58  ;;  %v3388_v61 = vsel %vm3381_vm4, %v3384_v54, %v3387_v19 }
 0x251   :  { %v1724_v51 = vsel %vm1713_vm6, nan, %v1723_v14  ;;  %v1808_v37 = vmul.f32 %v1807_v34, %v1805_v1  ;;  %v3389_v2 = vsel %vm1713_vm6, nan, %v3388_v61 }
 0x252   :  { %1843 = vst [vmem:[#allocation2 + $0x70] sm:$0xff] %v1724_v51  ;;  %3507 = vst [vmem:[#allocation2 + $0xf0] sm:$0xff] %v3389_v2 }
 0x253   :  { %v1809_v33 = vxor.u32 2147483648, %v1808_v37 }
 0x255   :  { %v1810_v20 = vsel %vm1727_vm7, %v1809_v33, %v1808_v37 }
 0x256   :  { %v1813_v25 = vsel %vm1726_vm8, %v5294_v38, %v1810_v20 }
 0x257   :  { %3793 = vcosq.f32 %v1813_v25 }
 0x258   :  { %3795 = vsinq.f32 %v1813_v25 }
 0x261   :  { %v3794_v10 = vpop.eup %3793 }
 0x262   :  { %v3796_v49 = vpop.eup %3795  ;;  %v1825_v43 = vxor.u32 2147483648, %v3794_v10 }
 0x263   :  { %v1822_v22 = vxor.u32 2147483648, %v3796_v49 }
 0x264   :  { %v1826_v3 = vsel %vm1824_vm9, %v1825_v43, %v3796_v49  ;;  %v3490_v57 = vsel %vm3488_vm10, %v1825_v43, %v3796_v49 }
 0x265   :  { %v1823_v52 = vsel %vm1821_vm11, %v3794_v10, %v1822_v22  ;;  %v3487_v30 = vsel %vm3485_vm12, %v3794_v10, %v1822_v22 }
 0x266   :  { %v1827_v4 = vsel %vm1820_vm13, %v1823_v52, %v1826_v3  ;;  %v3491_v6 = vsel %vm3484_vm14, %v3487_v30, %v3490_v57 }
 0x267   :  { %v1828_v31 = vsel %vm1817_vm15, nan, %v1827_v4  ;;  %v3492_v39 = vsel %vm1817_vm15, nan, %v3491_v6 }
 0x268   :  { %1844 = vst [vmem:[#allocation2 + $0x78] sm:$0xff] %v1828_v31  ;;  %3508 = vst [vmem:[#allocation2 + $0xf8] sm:$0xff] %v3492_v39 }
 0x269   :  { %3808 = shalt.err (!%p3805_p4)
}
 0x26a   :  { %s3809_s4 = scalar_lea.hbm %s5546_s2, 4096 }
 0x26b   :  { %p3810_p5 = scmp.ne.s32.totalorder %s5546_s2, %s3809_s4  ;;  %p3813_p6 = scmp.lt.u32.totalorder %s3809_s4, %s5546_s2 }
 0x26d   :  { %p3815_p7 = pnand %p3813_p6, %p3810_p5 }
 0x26f   :  { %3818 = shalt.err (!%p3815_p7)
}
 0x270   :  { %s3830_s9 = smov 256   ;;  %s3831_s10 = smov 16  }
 0x271   :  { %3520 = dma.vmem_to_hbm [thread:$0]  %s3515_s28, 4096, %s5546_s2, [#allocation3], %s3830_s9, %s3830_s9, %s3831_s10  }
 0x272   :  { %3819 = dma.done.wait [#allocation3], 4096  }
 0x273   :  { %3820 = vsyncadd [#allocation3], 4294963200 }
 0x274   :  { %3524 = vsyncpa [#allocation3], 1 }

</bundles_post_ra>
